<compile_context>
chip_gen: v6e
topology: v6e:2x2x1
jax: 0.10.0
libtpu: 0.0.40
codegen_flags: <defaults>
</compile_context>

<pallas_src>
import functools

import jax
import jax.numpy as jnp
from jax.experimental import pallas as pl
from jax.experimental.pallas import tpu as pltpu

EPS = 1e-5
SQRT_HALF = 0.7071067811865476  # torch.sqrt(FloatTensor([0.5]))


def _decoder_kernel(steps_x_ref,
                    w_sh_val_ref, w_sh_gate_ref,
                    g_sh_val_ref, b_sh_val_ref, g_sh_gate_ref, b_sh_gate_ref,
                    w_sp_val_ref, w_sp_gate_ref,
                    g_sp_val_ref, b_sp_val_ref, g_sp_gate_ref, b_sp_gate_ref,
                    w_rec_t_ref, o_ref,
                    *, n_steps, n_shared, n_independent, n_d, K, vbs):
    f32 = jnp.float32
    inv_n = 1.0 / float(vbs)

    def gbn(z, gamma, beta):
        # z: (..., vbs, n_d).  Per-ghost-batch BatchNorm1d (training stats,
        # biased variance) fused into a single scale/shift; no centered
        # intermediate is materialized.
        mean = jnp.sum(z, axis=-2, keepdims=True) * inv_n
        var = jnp.sum(z * z, axis=-2, keepdims=True) * inv_n - mean * mean
        scale = gamma * jax.lax.rsqrt(var + EPS)
        shift = beta - mean * scale
        return z * scale + shift

    def glu_layer(xg, w_val, w_gate, g_val, b_val, g_gate, b_gate):
        # xg: (..., vbs, n_d) grouped by ghost batch.  Weights are pre-split
        # into value/gate halves, so there is no lane-offset slice in-kernel.
        gshape = xg.shape
        x2 = xg.reshape(-1, n_d)                         # sublane-dim merge only
        zv = jnp.dot(x2, w_val, preferred_element_type=f32).reshape(gshape)
        zg = jnp.dot(x2, w_gate, preferred_element_type=f32).reshape(gshape)
        zv = gbn(zv, g_val, b_val)
        zg = gbn(zg, g_gate, b_gate)
        return zv * jax.nn.sigmoid(zg)

    # ---- tiny parameters: read once per grid step (constant index maps) ----
    w_sh_val = w_sh_val_ref[...].astype(f32)      # (n_shared, n_d, n_d)
    w_sh_gate = w_sh_gate_ref[...].astype(f32)
    g_sh_val = g_sh_val_ref[...].astype(f32)      # (n_steps, n_shared, n_d)
    b_sh_val = b_sh_val_ref[...].astype(f32)
    g_sh_gate = g_sh_gate_ref[...].astype(f32)
    b_sh_gate = b_sh_gate_ref[...].astype(f32)
    w_sp_val = w_sp_val_ref[...].astype(f32)      # (n_steps, n_indep, n_d, n_d)
    w_sp_gate = w_sp_gate_ref[...].astype(f32)
    g_sp_val = g_sp_val_ref[...].astype(f32)      # (n_steps, n_indep, n_d)
    b_sp_val = b_sp_val_ref[...].astype(f32)
    g_sp_gate = g_sp_gate_ref[...].astype(f32)
    b_sp_gate = b_sp_gate_ref[...].astype(f32)

    # ---- shared GLU block, batched across ALL steps (fc weights shared) ----
    # Grouped layout (n_steps, K, vbs, n_d): matmuls flatten to ONE tall
    # (n_steps*K*vbs, n_d) @ (n_d, n_d) MXU call per layer; GBN params differ
    # per step so gamma/beta broadcast over the step axis.
    x_sh = steps_x_ref[...].astype(f32).reshape(n_steps, K, vbs, n_d)
    for l in range(n_shared):
        gv = g_sh_val[:, l].reshape(n_steps, 1, 1, n_d)
        bv = b_sh_val[:, l].reshape(n_steps, 1, 1, n_d)
        gg = g_sh_gate[:, l].reshape(n_steps, 1, 1, n_d)
        bg = b_sh_gate[:, l].reshape(n_steps, 1, 1, n_d)
        y = glu_layer(x_sh, w_sh_val[l], w_sh_gate[l], gv, bv, gg, bg)
        if l == 0:          # first=True: first layer replaces x (no residual)
            x_sh = y
        else:
            x_sh = (x_sh + y) * SQRT_HALF

    # ---- independent GLU block: per-step weights ----------------------------
    res = jnp.zeros((K, vbs, n_d), f32)
    for s in range(n_steps):
        x = x_sh[s]                                   # (K, vbs, n_d)
        for l in range(n_independent):
            y = glu_layer(
                x, w_sp_val[s, l], w_sp_gate[s, l],
                g_sp_val[s, l].reshape(1, 1, n_d), b_sp_val[s, l].reshape(1, 1, n_d),
                g_sp_gate[s, l].reshape(1, 1, n_d), b_sp_gate[s, l].reshape(1, 1, n_d))
            x = (x + y) * SQRT_HALF
        res = res + x

    # ---- reconstruction, emitted TRANSPOSED for a lane-dense store ----------
    # out^T[i, r] = sum_d w_recon[d, i] * res[r, d]  (== (res @ W_recon)^T),
    # computed as dot_general(W_rec^T, res) contracting both dim-1's (A @ B.T).
    res2 = res.reshape(K * vbs, n_d)
    w_rec_t = w_rec_t_ref[...].astype(f32)            # (input_dim, n_d)
    out_t = jax.lax.dot_general(
        w_rec_t, res2,
        dimension_numbers=(((1,), (1,)), ((), ())),
        preferred_element_type=f32)                   # (input_dim, K*vbs)
    o_ref[...] = out_t.astype(o_ref.dtype)


def _choose_pack(n_chunks, chunk, n_steps, n_d, input_dim,
                 vmem_budget_bytes=40 * 1024 * 1024):
    """Ghost batches packed per grid step.

    Prefers exactly 2 big equal tiles (one per v7x TensorCore), then a single
    tile, then the largest 128-aligned divisor fitting a conservative VMEM
    budget (sized against v7x's 64 MiB physical VMEM; v5e/v6e have 128 MiB)."""

    def est_bytes(k):
        rows = k * chunk
        # double-buffered input block + ~8 live f32 step-batched intermediates
        # + double-buffered transposed output block; weights are negligible.
        return 4 * rows * (10 * n_steps * n_d + 2 * input_dim)

    def ok(k):
        # The lane-dense output store needs 128-aligned tile rows unless grid==1.
        aligned = (k * chunk) % 128 == 0 or k == n_chunks
        return aligned and est_bytes(k) <= vmem_budget_bytes

    if n_chunks % 2 == 0 and ok(n_chunks // 2):
        return n_chunks // 2                      # grid == 2 (v7x megacore)
    if est_bytes(n_chunks) <= vmem_budget_bytes:
        return n_chunks                           # grid == 1
    best = None
    for k in range(1, n_chunks):
        if n_chunks % k == 0 and ok(k):
            best = k
    return best if best is not None else n_chunks


def _weight_spec(arr):
    return pl.BlockSpec(arr.shape, lambda i, _nd=arr.ndim: (0,) * _nd)


@functools.partial(jax.jit, static_argnames=("virtual_batch_size",))
def tabnet_decoder_forward(steps_x, w_shared, g_sh, b_sh,
                           w_spec, g_sp, b_sp, w_recon,
                           *, virtual_batch_size=128):
    """TabNetDecoder forward.

    steps_x : (n_steps, B, n_d)                    stacked steps_output
    w_shared: (n_shared, n_d, 2*n_d)               shared fc weights (x @ W)
    g_sh/b_sh: (n_steps, n_shared, 2*n_d)          per-step shared-layer GBN params
    w_spec  : (n_steps, n_independent, n_d, 2*n_d) independent fc weights
    g_sp/b_sp: (n_steps, n_independent, 2*n_d)     independent-layer GBN params
    w_recon : (n_d, input_dim)                     reconstruction (x @ W)
    """
    n_steps, B, n_d = steps_x.shape
    n_shared = w_shared.shape[0]
    n_independent = w_spec.shape[1]
    input_dim = w_recon.shape[1]
    assert n_shared >= 1 and n_independent >= 1, (
        "kernel implements the default decoder config (>=1 shared, >=1 independent)")

    # torch.chunk(ceil(B/vbs), 0): equal chunks of size ceil(B/n_chunks).
    n_chunks = -(-B // virtual_batch_size)
    chunk = -(-B // n_chunks)
    assert B % chunk == 0, (
        "kernel assumes equal-size ghost batches (B divisible by chunk size)")

    K = _choose_pack(n_chunks, chunk, n_steps, n_d, input_dim)
    tile_rows = K * chunk
    grid = n_chunks // K
    assert grid == 1 or tile_rows % 128 == 0, (
        "multi-tile grids require 128-aligned (lane-dense) tile rows")

    # Pre-split every GLU weight / BN parameter into value & gate halves (free,
    # wrapper side) so the kernel never slices at a lane offset of n_d.
    w_sh_val, w_sh_gate = w_shared[..., :n_d], w_shared[..., n_d:]
    g_sh_val, g_sh_gate = g_sh[..., :n_d], g_sh[..., n_d:]
    b_sh_val, b_sh_gate = b_sh[..., :n_d], b_sh[..., n_d:]
    w_sp_val, w_sp_gate = w_spec[..., :n_d], w_spec[..., n_d:]
    g_sp_val, g_sp_gate = g_sp[..., :n_d], g_sp[..., n_d:]
    b_sp_val, b_sp_gate = b_sp[..., :n_d], b_sp[..., n_d:]
    w_rec_t = w_recon.T                                # (input_dim, n_d)

    params = (w_sh_val, w_sh_gate, g_sh_val, b_sh_val, g_sh_gate, b_sh_gate,
              w_sp_val, w_sp_gate, g_sp_val, b_sp_val, g_sp_gate, b_sp_gate,
              w_rec_t)

    kernel = functools.partial(
        _decoder_kernel,
        n_steps=n_steps, n_shared=n_shared, n_independent=n_independent,
        n_d=n_d, K=K, vbs=chunk)

    out_t = pl.pallas_call(
        kernel,
        out_shape=jax.ShapeDtypeStruct((input_dim, B), steps_x.dtype),
        grid_spec=pl.GridSpec(
            grid=(grid,),
            in_specs=[pl.BlockSpec((n_steps, tile_rows, n_d), lambda i: (0, i, 0))]
                     + [_weight_spec(p) for p in params],
            out_specs=pl.BlockSpec((input_dim, tile_rows), lambda i: (0, i)),
        ),
        compiler_params=pltpu.CompilerParams(
            dimension_semantics=("parallel",),
            # Safe on all generations: <= v7x's 64 MiB physical VMEM, well above
            # the estimated per-tile footprint; v5e/v6e have 128 MiB physical.
            vmem_limit_bytes=48 * 1024 * 1024,
        ),
    )(steps_x, *params)

    # Kernel writes the reconstruction transposed (lane-dense store); restore
    # the module's (B, input_dim) layout with a cheap wrapper-side transpose.
    return out_t.T


# ----------------------------------------------------------------------------
# Pure-JAX reference matching the PyTorch module in training mode.
# ----------------------------------------------------------------------------
def _reference(steps_x, w_shared, g_sh, b_sh, w_spec, g_sp, b_sp, w_recon, vbs):
    n_steps, B, n_d = steps_x.shape
    n_shared = w_shared.shape[0]
    n_independent = w_spec.shape[1]
    n_chunks = -(-B // vbs)

    def gbn(x, gamma, beta):
        outs = []
        for c in jnp.split(x, n_chunks, axis=0):
            m = jnp.mean(c, axis=0, keepdims=True)
            v = jnp.mean((c - m) ** 2, axis=0, keepdims=True)
            outs.append((c - m) / jnp.sqrt(v + EPS) * gamma[None, :] + beta[None, :])
        return jnp.concatenate(outs, axis=0)

    def glu_layer(x, w, gamma, beta):
        z = gbn(x @ w, gamma, beta)
        return z[:, :n_d] * jax.nn.sigmoid(z[:, n_d:])

    res = jnp.zeros((B, n_d), jnp.float32)
    for s in range(n_steps):
        x = steps_x[s]
        x = glu_layer(x, w_shared[0], g_sh[s, 0], b_sh[s, 0])
        for l in range(1, n_shared):
            x = (x + glu_layer(x, w_shared[l], g_sh[s, l], b_sh[s, l])) * SQRT_HALF
        for l in range(n_independent):
            x = (x + glu_layer(x, w_spec[s, l], g_sp[s, l], b_sp[s, l])) * SQRT_HALF
        res = res + x
    return res @ w_recon


def _run_case(key, B, n_d, input_dim, n_steps, n_shared, n_independent, vbs):
    ks = jax.random.split(key, 8)
    steps_x = jax.random.normal(ks[0], (n_steps, B, n_d), dtype=jnp.float32)
    w_shared = 0.3 * jax.random.normal(ks[1], (n_shared, n_d, 2 * n_d), jnp.float32)
    g_sh = 1.0 + 0.1 * jax.random.normal(ks[2], (n_steps, n_shared, 2 * n_d), jnp.float32)
    b_sh = 0.1 * jax.random.normal(ks[3], (n_steps, n_shared, 2 * n_d), jnp.float32)
    w_spec = 0.3 * jax.random.normal(ks[4], (n_steps, n_independent, n_d, 2 * n_d), jnp.float32)
    g_sp = 1.0 + 0.1 * jax.random.normal(ks[5], (n_steps, n_independent, 2 * n_d), jnp.float32)
    b_sp = 0.1 * jax.random.normal(ks[6], (n_steps, n_independent, 2 * n_d), jnp.float32)
    w_recon = 0.3 * jax.random.normal(ks[7], (n_d, input_dim), jnp.float32)

    out = tabnet_decoder_forward(steps_x, w_shared, g_sh, b_sh,
                                 w_spec, g_sp, b_sp, w_recon,
                                 virtual_batch_size=vbs)
    out = jax.block_until_ready(out)

    ref = _reference(steps_x, w_shared, g_sh, b_sh, w_spec, g_sp, b_sp, w_recon, vbs)
    assert out.shape == (B, input_dim)
    assert jnp.allclose(out, ref, rtol=1e-3, atol=1e-3), "mismatch vs reference"


if __name__ == "__main__":
    key = jax.random.PRNGKey(0)
    k1, k2 = jax.random.split(key)
    # Small config consistent with module defaults (n_d=8, 3 steps, 1 shared,
    # 1 independent): 2 ghost batches of 8 rows, single tile (grid=1).
    _run_case(k1, B=16, n_d=8, input_dim=32, n_steps=3,
              n_shared=1, n_independent=1, vbs=8)
    # Default vbs=128, deeper GLU blocks: 4 ghost batches packed into 2
    # lane-dense tiles of 256 rows (grid=2, one per v7x TensorCore).
    _run_case(k2, B=512, n_d=8, input_dim=32, n_steps=3,
              n_shared=2, n_independent=2, vbs=128)
    print("KERNEL_OK")
</pallas_src>

<mosaic_0001>
module attributes {stable_mosaic.version = 11 : i64} {
  func.func @_decoder_kernel(%arg0: i32, %arg1: memref<3x16x8xf32, #tpu.memory_space<vmem>>, %arg2: memref<1x8x8xf32, #tpu.memory_space<vmem>>, %arg3: memref<1x8x8xf32, #tpu.memory_space<vmem>>, %arg4: memref<3x1x8xf32, #tpu.memory_space<vmem>>, %arg5: memref<3x1x8xf32, #tpu.memory_space<vmem>>, %arg6: memref<3x1x8xf32, #tpu.memory_space<vmem>>, %arg7: memref<3x1x8xf32, #tpu.memory_space<vmem>>, %arg8: memref<3x1x8x8xf32, #tpu.memory_space<vmem>>, %arg9: memref<3x1x8x8xf32, #tpu.memory_space<vmem>>, %arg10: memref<3x1x8xf32, #tpu.memory_space<vmem>>, %arg11: memref<3x1x8xf32, #tpu.memory_space<vmem>>, %arg12: memref<3x1x8xf32, #tpu.memory_space<vmem>>, %arg13: memref<3x1x8xf32, #tpu.memory_space<vmem>>, %arg14: memref<32x8xf32, #tpu.memory_space<vmem>>, %arg15: memref<32x16xf32, #tpu.memory_space<vmem>>) attributes {dimension_semantics = [#tpu.dimension_semantics<parallel>], iteration_bounds = array<i64: 1>, scalar_prefetch = 0 : i64, scratch_operands = 0 : i64, tpu.core_type = #tpu.core_type<tc>, window_params = [{transform_indices = @transform_0, window_bounds = array<i64: 3, 16, 8>}, {pipeline_mode = #tpu.pipeline_mode<synchronous>, transform_indices = @transform_1, window_bounds = array<i64: 1, 8, 8>}, {pipeline_mode = #tpu.pipeline_mode<synchronous>, transform_indices = @transform_2, window_bounds = array<i64: 1, 8, 8>}, {pipeline_mode = #tpu.pipeline_mode<synchronous>, transform_indices = @transform_3, window_bounds = array<i64: 3, 1, 8>}, {pipeline_mode = #tpu.pipeline_mode<synchronous>, transform_indices = @transform_4, window_bounds = array<i64: 3, 1, 8>}, {pipeline_mode = #tpu.pipeline_mode<synchronous>, transform_indices = @transform_5, window_bounds = array<i64: 3, 1, 8>}, {pipeline_mode = #tpu.pipeline_mode<synchronous>, transform_indices = @transform_6, window_bounds = array<i64: 3, 1, 8>}, {pipeline_mode = #tpu.pipeline_mode<synchronous>, transform_indices = @transform_7, window_bounds = array<i64: 3, 1, 8, 8>}, {pipeline_mode = #tpu.pipeline_mode<synchronous>, transform_indices = @transform_8, window_bounds = array<i64: 3, 1, 8, 8>}, {pipeline_mode = #tpu.pipeline_mode<synchronous>, transform_indices = @transform_9, window_bounds = array<i64: 3, 1, 8>}, {pipeline_mode = #tpu.pipeline_mode<synchronous>, transform_indices = @transform_10, window_bounds = array<i64: 3, 1, 8>}, {pipeline_mode = #tpu.pipeline_mode<synchronous>, transform_indices = @transform_11, window_bounds = array<i64: 3, 1, 8>}, {pipeline_mode = #tpu.pipeline_mode<synchronous>, transform_indices = @transform_12, window_bounds = array<i64: 3, 1, 8>}, {pipeline_mode = #tpu.pipeline_mode<synchronous>, transform_indices = @transform_13, window_bounds = array<i64: 32, 8>}, {transform_indices = @transform_14, window_bounds = array<i64: 32, 16>}]} {
    %c0 = arith.constant 0 : index
    %c0_0 = arith.constant 0 : index
    %c0_1 = arith.constant 0 : index
    %0 = vector.load %arg2[%c0, %c0_0, %c0_1] : memref<1x8x8xf32, #tpu.memory_space<vmem>>, vector<1x8x8xf32>
    %c0_2 = arith.constant 0 : index
    %c0_3 = arith.constant 0 : index
    %c0_4 = arith.constant 0 : index
    %1 = vector.load %arg3[%c0_2, %c0_3, %c0_4] : memref<1x8x8xf32, #tpu.memory_space<vmem>>, vector<1x8x8xf32>
    %c0_5 = arith.constant 0 : index
    %c0_6 = arith.constant 0 : index
    %c0_7 = arith.constant 0 : index
    %2 = vector.load %arg4[%c0_5, %c0_6, %c0_7] : memref<3x1x8xf32, #tpu.memory_space<vmem>>, vector<3x1x8xf32>
    %c0_8 = arith.constant 0 : index
    %c0_9 = arith.constant 0 : index
    %c0_10 = arith.constant 0 : index
    %3 = vector.load %arg5[%c0_8, %c0_9, %c0_10] : memref<3x1x8xf32, #tpu.memory_space<vmem>>, vector<3x1x8xf32>
    %c0_11 = arith.constant 0 : index
    %c0_12 = arith.constant 0 : index
    %c0_13 = arith.constant 0 : index
    %4 = vector.load %arg6[%c0_11, %c0_12, %c0_13] : memref<3x1x8xf32, #tpu.memory_space<vmem>>, vector<3x1x8xf32>
    %c0_14 = arith.constant 0 : index
    %c0_15 = arith.constant 0 : index
    %c0_16 = arith.constant 0 : index
    %5 = vector.load %arg7[%c0_14, %c0_15, %c0_16] : memref<3x1x8xf32, #tpu.memory_space<vmem>>, vector<3x1x8xf32>
    %c0_17 = arith.constant 0 : index
    %c0_18 = arith.constant 0 : index
    %c0_19 = arith.constant 0 : index
    %c0_20 = arith.constant 0 : index
    %6 = vector.load %arg8[%c0_17, %c0_18, %c0_19, %c0_20] : memref<3x1x8x8xf32, #tpu.memory_space<vmem>>, vector<3x1x8x8xf32>
    %c0_21 = arith.constant 0 : index
    %c0_22 = arith.constant 0 : index
    %c0_23 = arith.constant 0 : index
    %c0_24 = arith.constant 0 : index
    %7 = vector.load %arg9[%c0_21, %c0_22, %c0_23, %c0_24] : memref<3x1x8x8xf32, #tpu.memory_space<vmem>>, vector<3x1x8x8xf32>
    %c0_25 = arith.constant 0 : index
    %c0_26 = arith.constant 0 : index
    %c0_27 = arith.constant 0 : index
    %8 = vector.load %arg10[%c0_25, %c0_26, %c0_27] : memref<3x1x8xf32, #tpu.memory_space<vmem>>, vector<3x1x8xf32>
    %c0_28 = arith.constant 0 : index
    %c0_29 = arith.constant 0 : index
    %c0_30 = arith.constant 0 : index
    %9 = vector.load %arg11[%c0_28, %c0_29, %c0_30] : memref<3x1x8xf32, #tpu.memory_space<vmem>>, vector<3x1x8xf32>
    %c0_31 = arith.constant 0 : index
    %c0_32 = arith.constant 0 : index
    %c0_33 = arith.constant 0 : index
    %10 = vector.load %arg12[%c0_31, %c0_32, %c0_33] : memref<3x1x8xf32, #tpu.memory_space<vmem>>, vector<3x1x8xf32>
    %c0_34 = arith.constant 0 : index
    %c0_35 = arith.constant 0 : index
    %c0_36 = arith.constant 0 : index
    %11 = vector.load %arg13[%c0_34, %c0_35, %c0_36] : memref<3x1x8xf32, #tpu.memory_space<vmem>>, vector<3x1x8xf32>
    %c0_37 = arith.constant 0 : index
    %c0_38 = arith.constant 0 : index
    %c0_39 = arith.constant 0 : index
    %12 = vector.load %arg1[%c0_37, %c0_38, %c0_39] : memref<3x16x8xf32, #tpu.memory_space<vmem>>, vector<3x16x8xf32>
    %13 = vector.shape_cast %12 : vector<3x16x8xf32> to vector<3x2x8x8xf32>
    %14 = vector.shape_cast %2 : vector<3x1x8xf32> to vector<3x8xf32>
    %15 = vector.shape_cast %14 : vector<3x8xf32> to vector<3x1x1x8xf32>
    %16 = vector.shape_cast %3 : vector<3x1x8xf32> to vector<3x8xf32>
    %17 = vector.shape_cast %16 : vector<3x8xf32> to vector<3x1x1x8xf32>
    %18 = vector.shape_cast %4 : vector<3x1x8xf32> to vector<3x8xf32>
    %19 = vector.shape_cast %18 : vector<3x8xf32> to vector<3x1x1x8xf32>
    %20 = vector.shape_cast %5 : vector<3x1x8xf32> to vector<3x8xf32>
    %21 = vector.shape_cast %20 : vector<3x8xf32> to vector<3x1x1x8xf32>
    %22 = vector.shape_cast %0 : vector<1x8x8xf32> to vector<8x8xf32>
    %23 = vector.shape_cast %1 : vector<1x8x8xf32> to vector<8x8xf32>
    %24 = vector.shape_cast %13 : vector<3x2x8x8xf32> to vector<48x8xf32>
    %cst = arith.constant dense<0.000000e+00> : vector<48x8xf32>
    %25 = tpu.matmul %24, %22, %cst {dimension_numbers = #tpu.dot_dimension_numbers<[1], [0], [0], [1], [0, 0, 1, 1], [], []>} : vector<48x8xf32>, vector<8x8xf32>, vector<48x8xf32> -> vector<48x8xf32>
    %26 = vector.shape_cast %25 : vector<48x8xf32> to vector<3x2x8x8xf32>
    %cst_40 = arith.constant dense<0.000000e+00> : vector<48x8xf32>
    %27 = tpu.matmul %24, %23, %cst_40 {dimension_numbers = #tpu.dot_dimension_numbers<[1], [0], [0], [1], [0, 0, 1, 1], [], []>} : vector<48x8xf32>, vector<8x8xf32>, vector<48x8xf32> -> vector<48x8xf32>
    %28 = vector.shape_cast %27 : vector<48x8xf32> to vector<3x2x8x8xf32>
    %cst_41 = arith.constant dense<0.000000e+00> : vector<3x2x8xf32>
    %29 = vector.multi_reduction <add>, %26, %cst_41 [2] : vector<3x2x8x8xf32> to vector<3x2x8xf32>
    %30 = vector.shape_cast %29 : vector<3x2x8xf32> to vector<3x2x1x8xf32>
    %cst_42 = arith.constant 1.250000e-01 : f32
    %31 = vector.broadcast %cst_42 : f32 to vector<3x2x1x8xf32>
    %32 = arith.mulf %30, %31 : vector<3x2x1x8xf32>
    %33 = arith.mulf %26, %26 : vector<3x2x8x8xf32>
    %cst_43 = arith.constant dense<0.000000e+00> : vector<3x2x8xf32>
    %34 = vector.multi_reduction <add>, %33, %cst_43 [2] : vector<3x2x8x8xf32> to vector<3x2x8xf32>
    %35 = vector.shape_cast %34 : vector<3x2x8xf32> to vector<3x2x1x8xf32>
    %cst_44 = arith.constant 1.250000e-01 : f32
    %36 = vector.broadcast %cst_44 : f32 to vector<3x2x1x8xf32>
    %37 = arith.mulf %35, %36 : vector<3x2x1x8xf32>
    %38 = arith.mulf %32, %32 : vector<3x2x1x8xf32>
    %39 = arith.subf %37, %38 : vector<3x2x1x8xf32>
    %cst_45 = arith.constant 9.99999974E-6 : f32
    %40 = vector.broadcast %cst_45 : f32 to vector<3x2x1x8xf32>
    %41 = arith.addf %39, %40 : vector<3x2x1x8xf32>
    %42 = math.rsqrt %41 : vector<3x2x1x8xf32>
    %43 = vector.broadcast %15 : vector<3x1x1x8xf32> to vector<3x2x1x8xf32>
    %44 = arith.mulf %43, %42 : vector<3x2x1x8xf32>
    %45 = arith.mulf %32, %44 : vector<3x2x1x8xf32>
    %46 = vector.broadcast %17 : vector<3x1x1x8xf32> to vector<3x2x1x8xf32>
    %47 = arith.subf %46, %45 : vector<3x2x1x8xf32>
    %48 = vector.broadcast %44 : vector<3x2x1x8xf32> to vector<3x2x8x8xf32>
    %49 = arith.mulf %26, %48 : vector<3x2x8x8xf32>
    %50 = vector.broadcast %47 : vector<3x2x1x8xf32> to vector<3x2x8x8xf32>
    %51 = arith.addf %49, %50 : vector<3x2x8x8xf32>
    %cst_46 = arith.constant dense<0.000000e+00> : vector<3x2x8xf32>
    %52 = vector.multi_reduction <add>, %28, %cst_46 [2] : vector<3x2x8x8xf32> to vector<3x2x8xf32>
    %53 = vector.shape_cast %52 : vector<3x2x8xf32> to vector<3x2x1x8xf32>
    %cst_47 = arith.constant 1.250000e-01 : f32
    %54 = vector.broadcast %cst_47 : f32 to vector<3x2x1x8xf32>
    %55 = arith.mulf %53, %54 : vector<3x2x1x8xf32>
    %56 = arith.mulf %28, %28 : vector<3x2x8x8xf32>
    %cst_48 = arith.constant dense<0.000000e+00> : vector<3x2x8xf32>
    %57 = vector.multi_reduction <add>, %56, %cst_48 [2] : vector<3x2x8x8xf32> to vector<3x2x8xf32>
    %58 = vector.shape_cast %57 : vector<3x2x8xf32> to vector<3x2x1x8xf32>
    %cst_49 = arith.constant 1.250000e-01 : f32
    %59 = vector.broadcast %cst_49 : f32 to vector<3x2x1x8xf32>
    %60 = arith.mulf %58, %59 : vector<3x2x1x8xf32>
    %61 = arith.mulf %55, %55 : vector<3x2x1x8xf32>
    %62 = arith.subf %60, %61 : vector<3x2x1x8xf32>
    %cst_50 = arith.constant 9.99999974E-6 : f32
    %63 = vector.broadcast %cst_50 : f32 to vector<3x2x1x8xf32>
    %64 = arith.addf %62, %63 : vector<3x2x1x8xf32>
    %65 = math.rsqrt %64 : vector<3x2x1x8xf32>
    %66 = vector.broadcast %19 : vector<3x1x1x8xf32> to vector<3x2x1x8xf32>
    %67 = arith.mulf %66, %65 : vector<3x2x1x8xf32>
    %68 = arith.mulf %55, %67 : vector<3x2x1x8xf32>
    %69 = vector.broadcast %21 : vector<3x1x1x8xf32> to vector<3x2x1x8xf32>
    %70 = arith.subf %69, %68 : vector<3x2x1x8xf32>
    %71 = vector.broadcast %67 : vector<3x2x1x8xf32> to vector<3x2x8x8xf32>
    %72 = arith.mulf %28, %71 : vector<3x2x8x8xf32>
    %73 = vector.broadcast %70 : vector<3x2x1x8xf32> to vector<3x2x8x8xf32>
    %74 = arith.addf %72, %73 : vector<3x2x8x8xf32>
    %75 = arith.negf %74 : vector<3x2x8x8xf32>
    %76 = math.exp %75 : vector<3x2x8x8xf32>
    %cst_51 = arith.constant 1.000000e+00 : f32
    %77 = vector.broadcast %cst_51 : f32 to vector<3x2x8x8xf32>
    %78 = arith.addf %77, %76 : vector<3x2x8x8xf32>
    %79 = arith.divf %77, %78 : vector<3x2x8x8xf32>
    %80 = arith.mulf %51, %79 : vector<3x2x8x8xf32>
    %cst_52 = arith.constant 0.000000e+00 : f32
    %81 = vector.broadcast %cst_52 : f32 to vector<2x8x8xf32>
    %82 = vector.extract_strided_slice %80 {offsets = [0, 0, 0, 0], sizes = [1, 2, 8, 8], strides = [1, 1, 1, 1]} : vector<3x2x8x8xf32> to vector<1x2x8x8xf32>
    %83 = vector.shape_cast %82 : vector<1x2x8x8xf32> to vector<2x8x8xf32>
    %84 = vector.extract_strided_slice %6 {offsets = [0, 0, 0, 0], sizes = [1, 1, 8, 8], strides = [1, 1, 1, 1]} : vector<3x1x8x8xf32> to vector<1x1x8x8xf32>
    %85 = vector.shape_cast %84 : vector<1x1x8x8xf32> to vector<8x8xf32>
    %86 = vector.extract_strided_slice %7 {offsets = [0, 0, 0, 0], sizes = [1, 1, 8, 8], strides = [1, 1, 1, 1]} : vector<3x1x8x8xf32> to vector<1x1x8x8xf32>
    %87 = vector.shape_cast %86 : vector<1x1x8x8xf32> to vector<8x8xf32>
    %88 = vector.extract_strided_slice %8 {offsets = [0, 0, 0], sizes = [1, 1, 8], strides = [1, 1, 1]} : vector<3x1x8xf32> to vector<1x1x8xf32>
    %89 = vector.shape_cast %88 : vector<1x1x8xf32> to vector<8xf32>
    %90 = vector.shape_cast %89 : vector<8xf32> to vector<1x1x8xf32>
    %91 = vector.extract_strided_slice %9 {offsets = [0, 0, 0], sizes = [1, 1, 8], strides = [1, 1, 1]} : vector<3x1x8xf32> to vector<1x1x8xf32>
    %92 = vector.shape_cast %91 : vector<1x1x8xf32> to vector<8xf32>
    %93 = vector.shape_cast %92 : vector<8xf32> to vector<1x1x8xf32>
    %94 = vector.extract_strided_slice %10 {offsets = [0, 0, 0], sizes = [1, 1, 8], strides = [1, 1, 1]} : vector<3x1x8xf32> to vector<1x1x8xf32>
    %95 = vector.shape_cast %94 : vector<1x1x8xf32> to vector<8xf32>
    %96 = vector.shape_cast %95 : vector<8xf32> to vector<1x1x8xf32>
    %97 = vector.extract_strided_slice %11 {offsets = [0, 0, 0], sizes = [1, 1, 8], strides = [1, 1, 1]} : vector<3x1x8xf32> to vector<1x1x8xf32>
    %98 = vector.shape_cast %97 : vector<1x1x8xf32> to vector<8xf32>
    %99 = vector.shape_cast %98 : vector<8xf32> to vector<1x1x8xf32>
    %100 = vector.shape_cast %83 : vector<2x8x8xf32> to vector<16x8xf32>
    %cst_53 = arith.constant dense<0.000000e+00> : vector<16x8xf32>
    %101 = tpu.matmul %100, %85, %cst_53 {dimension_numbers = #tpu.dot_dimension_numbers<[1], [0], [0], [1], [0, 0, 1, 1], [], []>} : vector<16x8xf32>, vector<8x8xf32>, vector<16x8xf32> -> vector<16x8xf32>
    %102 = vector.shape_cast %101 : vector<16x8xf32> to vector<2x8x8xf32>
    %cst_54 = arith.constant dense<0.000000e+00> : vector<16x8xf32>
    %103 = tpu.matmul %100, %87, %cst_54 {dimension_numbers = #tpu.dot_dimension_numbers<[1], [0], [0], [1], [0, 0, 1, 1], [], []>} : vector<16x8xf32>, vector<8x8xf32>, vector<16x8xf32> -> vector<16x8xf32>
    %104 = vector.shape_cast %103 : vector<16x8xf32> to vector<2x8x8xf32>
    %cst_55 = arith.constant dense<0.000000e+00> : vector<2x8xf32>
    %105 = vector.multi_reduction <add>, %102, %cst_55 [1] : vector<2x8x8xf32> to vector<2x8xf32>
    %106 = vector.shape_cast %105 : vector<2x8xf32> to vector<2x1x8xf32>
    %cst_56 = arith.constant 1.250000e-01 : f32
    %107 = vector.broadcast %cst_56 : f32 to vector<2x1x8xf32>
    %108 = arith.mulf %106, %107 : vector<2x1x8xf32>
    %109 = arith.mulf %102, %102 : vector<2x8x8xf32>
    %cst_57 = arith.constant dense<0.000000e+00> : vector<2x8xf32>
    %110 = vector.multi_reduction <add>, %109, %cst_57 [1] : vector<2x8x8xf32> to vector<2x8xf32>
    %111 = vector.shape_cast %110 : vector<2x8xf32> to vector<2x1x8xf32>
    %cst_58 = arith.constant 1.250000e-01 : f32
    %112 = vector.broadcast %cst_58 : f32 to vector<2x1x8xf32>
    %113 = arith.mulf %111, %112 : vector<2x1x8xf32>
    %114 = arith.mulf %108, %108 : vector<2x1x8xf32>
    %115 = arith.subf %113, %114 : vector<2x1x8xf32>
    %cst_59 = arith.constant 9.99999974E-6 : f32
    %116 = vector.broadcast %cst_59 : f32 to vector<2x1x8xf32>
    %117 = arith.addf %115, %116 : vector<2x1x8xf32>
    %118 = math.rsqrt %117 : vector<2x1x8xf32>
    %119 = vector.broadcast %90 : vector<1x1x8xf32> to vector<2x1x8xf32>
    %120 = arith.mulf %119, %118 : vector<2x1x8xf32>
    %121 = arith.mulf %108, %120 : vector<2x1x8xf32>
    %122 = vector.broadcast %93 : vector<1x1x8xf32> to vector<2x1x8xf32>
    %123 = arith.subf %122, %121 : vector<2x1x8xf32>
    %124 = vector.broadcast %120 : vector<2x1x8xf32> to vector<2x8x8xf32>
    %125 = arith.mulf %102, %124 : vector<2x8x8xf32>
    %126 = vector.broadcast %123 : vector<2x1x8xf32> to vector<2x8x8xf32>
    %127 = arith.addf %125, %126 : vector<2x8x8xf32>
    %cst_60 = arith.constant dense<0.000000e+00> : vector<2x8xf32>
    %128 = vector.multi_reduction <add>, %104, %cst_60 [1] : vector<2x8x8xf32> to vector<2x8xf32>
    %129 = vector.shape_cast %128 : vector<2x8xf32> to vector<2x1x8xf32>
    %cst_61 = arith.constant 1.250000e-01 : f32
    %130 = vector.broadcast %cst_61 : f32 to vector<2x1x8xf32>
    %131 = arith.mulf %129, %130 : vector<2x1x8xf32>
    %132 = arith.mulf %104, %104 : vector<2x8x8xf32>
    %cst_62 = arith.constant dense<0.000000e+00> : vector<2x8xf32>
    %133 = vector.multi_reduction <add>, %132, %cst_62 [1] : vector<2x8x8xf32> to vector<2x8xf32>
    %134 = vector.shape_cast %133 : vector<2x8xf32> to vector<2x1x8xf32>
    %cst_63 = arith.constant 1.250000e-01 : f32
    %135 = vector.broadcast %cst_63 : f32 to vector<2x1x8xf32>
    %136 = arith.mulf %134, %135 : vector<2x1x8xf32>
    %137 = arith.mulf %131, %131 : vector<2x1x8xf32>
    %138 = arith.subf %136, %137 : vector<2x1x8xf32>
    %cst_64 = arith.constant 9.99999974E-6 : f32
    %139 = vector.broadcast %cst_64 : f32 to vector<2x1x8xf32>
    %140 = arith.addf %138, %139 : vector<2x1x8xf32>
    %141 = math.rsqrt %140 : vector<2x1x8xf32>
    %142 = vector.broadcast %96 : vector<1x1x8xf32> to vector<2x1x8xf32>
    %143 = arith.mulf %142, %141 : vector<2x1x8xf32>
    %144 = arith.mulf %131, %143 : vector<2x1x8xf32>
    %145 = vector.broadcast %99 : vector<1x1x8xf32> to vector<2x1x8xf32>
    %146 = arith.subf %145, %144 : vector<2x1x8xf32>
    %147 = vector.broadcast %143 : vector<2x1x8xf32> to vector<2x8x8xf32>
    %148 = arith.mulf %104, %147 : vector<2x8x8xf32>
    %149 = vector.broadcast %146 : vector<2x1x8xf32> to vector<2x8x8xf32>
    %150 = arith.addf %148, %149 : vector<2x8x8xf32>
    %151 = arith.negf %150 : vector<2x8x8xf32>
    %152 = math.exp %151 : vector<2x8x8xf32>
    %cst_65 = arith.constant 1.000000e+00 : f32
    %153 = vector.broadcast %cst_65 : f32 to vector<2x8x8xf32>
    %154 = arith.addf %153, %152 : vector<2x8x8xf32>
    %155 = arith.divf %153, %154 : vector<2x8x8xf32>
    %156 = arith.mulf %127, %155 : vector<2x8x8xf32>
    %157 = arith.addf %83, %156 : vector<2x8x8xf32>
    %cst_66 = arith.constant 0.707106769 : f32
    %158 = vector.broadcast %cst_66 : f32 to vector<2x8x8xf32>
    %159 = arith.mulf %157, %158 : vector<2x8x8xf32>
    %160 = arith.addf %81, %159 : vector<2x8x8xf32>
    %161 = vector.extract_strided_slice %80 {offsets = [1, 0, 0, 0], sizes = [1, 2, 8, 8], strides = [1, 1, 1, 1]} : vector<3x2x8x8xf32> to vector<1x2x8x8xf32>
    %162 = vector.shape_cast %161 : vector<1x2x8x8xf32> to vector<2x8x8xf32>
    %163 = vector.extract_strided_slice %6 {offsets = [1, 0, 0, 0], sizes = [1, 1, 8, 8], strides = [1, 1, 1, 1]} : vector<3x1x8x8xf32> to vector<1x1x8x8xf32>
    %164 = vector.shape_cast %163 : vector<1x1x8x8xf32> to vector<8x8xf32>
    %165 = vector.extract_strided_slice %7 {offsets = [1, 0, 0, 0], sizes = [1, 1, 8, 8], strides = [1, 1, 1, 1]} : vector<3x1x8x8xf32> to vector<1x1x8x8xf32>
    %166 = vector.shape_cast %165 : vector<1x1x8x8xf32> to vector<8x8xf32>
    %167 = vector.extract_strided_slice %8 {offsets = [1, 0, 0], sizes = [1, 1, 8], strides = [1, 1, 1]} : vector<3x1x8xf32> to vector<1x1x8xf32>
    %168 = vector.shape_cast %167 : vector<1x1x8xf32> to vector<8xf32>
    %169 = vector.shape_cast %168 : vector<8xf32> to vector<1x1x8xf32>
    %170 = vector.extract_strided_slice %9 {offsets = [1, 0, 0], sizes = [1, 1, 8], strides = [1, 1, 1]} : vector<3x1x8xf32> to vector<1x1x8xf32>
    %171 = vector.shape_cast %170 : vector<1x1x8xf32> to vector<8xf32>
    %172 = vector.shape_cast %171 : vector<8xf32> to vector<1x1x8xf32>
    %173 = vector.extract_strided_slice %10 {offsets = [1, 0, 0], sizes = [1, 1, 8], strides = [1, 1, 1]} : vector<3x1x8xf32> to vector<1x1x8xf32>
    %174 = vector.shape_cast %173 : vector<1x1x8xf32> to vector<8xf32>
    %175 = vector.shape_cast %174 : vector<8xf32> to vector<1x1x8xf32>
    %176 = vector.extract_strided_slice %11 {offsets = [1, 0, 0], sizes = [1, 1, 8], strides = [1, 1, 1]} : vector<3x1x8xf32> to vector<1x1x8xf32>
    %177 = vector.shape_cast %176 : vector<1x1x8xf32> to vector<8xf32>
    %178 = vector.shape_cast %177 : vector<8xf32> to vector<1x1x8xf32>
    %179 = vector.shape_cast %162 : vector<2x8x8xf32> to vector<16x8xf32>
    %cst_67 = arith.constant dense<0.000000e+00> : vector<16x8xf32>
    %180 = tpu.matmul %179, %164, %cst_67 {dimension_numbers = #tpu.dot_dimension_numbers<[1], [0], [0], [1], [0, 0, 1, 1], [], []>} : vector<16x8xf32>, vector<8x8xf32>, vector<16x8xf32> -> vector<16x8xf32>
    %181 = vector.shape_cast %180 : vector<16x8xf32> to vector<2x8x8xf32>
    %cst_68 = arith.constant dense<0.000000e+00> : vector<16x8xf32>
    %182 = tpu.matmul %179, %166, %cst_68 {dimension_numbers = #tpu.dot_dimension_numbers<[1], [0], [0], [1], [0, 0, 1, 1], [], []>} : vector<16x8xf32>, vector<8x8xf32>, vector<16x8xf32> -> vector<16x8xf32>
    %183 = vector.shape_cast %182 : vector<16x8xf32> to vector<2x8x8xf32>
    %cst_69 = arith.constant dense<0.000000e+00> : vector<2x8xf32>
    %184 = vector.multi_reduction <add>, %181, %cst_69 [1] : vector<2x8x8xf32> to vector<2x8xf32>
    %185 = vector.shape_cast %184 : vector<2x8xf32> to vector<2x1x8xf32>
    %cst_70 = arith.constant 1.250000e-01 : f32
    %186 = vector.broadcast %cst_70 : f32 to vector<2x1x8xf32>
    %187 = arith.mulf %185, %186 : vector<2x1x8xf32>
    %188 = arith.mulf %181, %181 : vector<2x8x8xf32>
    %cst_71 = arith.constant dense<0.000000e+00> : vector<2x8xf32>
    %189 = vector.multi_reduction <add>, %188, %cst_71 [1] : vector<2x8x8xf32> to vector<2x8xf32>
    %190 = vector.shape_cast %189 : vector<2x8xf32> to vector<2x1x8xf32>
    %cst_72 = arith.constant 1.250000e-01 : f32
    %191 = vector.broadcast %cst_72 : f32 to vector<2x1x8xf32>
    %192 = arith.mulf %190, %191 : vector<2x1x8xf32>
    %193 = arith.mulf %187, %187 : vector<2x1x8xf32>
    %194 = arith.subf %192, %193 : vector<2x1x8xf32>
    %cst_73 = arith.constant 9.99999974E-6 : f32
    %195 = vector.broadcast %cst_73 : f32 to vector<2x1x8xf32>
    %196 = arith.addf %194, %195 : vector<2x1x8xf32>
    %197 = math.rsqrt %196 : vector<2x1x8xf32>
    %198 = vector.broadcast %169 : vector<1x1x8xf32> to vector<2x1x8xf32>
    %199 = arith.mulf %198, %197 : vector<2x1x8xf32>
    %200 = arith.mulf %187, %199 : vector<2x1x8xf32>
    %201 = vector.broadcast %172 : vector<1x1x8xf32> to vector<2x1x8xf32>
    %202 = arith.subf %201, %200 : vector<2x1x8xf32>
    %203 = vector.broadcast %199 : vector<2x1x8xf32> to vector<2x8x8xf32>
    %204 = arith.mulf %181, %203 : vector<2x8x8xf32>
    %205 = vector.broadcast %202 : vector<2x1x8xf32> to vector<2x8x8xf32>
    %206 = arith.addf %204, %205 : vector<2x8x8xf32>
    %cst_74 = arith.constant dense<0.000000e+00> : vector<2x8xf32>
    %207 = vector.multi_reduction <add>, %183, %cst_74 [1] : vector<2x8x8xf32> to vector<2x8xf32>
    %208 = vector.shape_cast %207 : vector<2x8xf32> to vector<2x1x8xf32>
    %cst_75 = arith.constant 1.250000e-01 : f32
    %209 = vector.broadcast %cst_75 : f32 to vector<2x1x8xf32>
    %210 = arith.mulf %208, %209 : vector<2x1x8xf32>
    %211 = arith.mulf %183, %183 : vector<2x8x8xf32>
    %cst_76 = arith.constant dense<0.000000e+00> : vector<2x8xf32>
    %212 = vector.multi_reduction <add>, %211, %cst_76 [1] : vector<2x8x8xf32> to vector<2x8xf32>
    %213 = vector.shape_cast %212 : vector<2x8xf32> to vector<2x1x8xf32>
    %cst_77 = arith.constant 1.250000e-01 : f32
    %214 = vector.broadcast %cst_77 : f32 to vector<2x1x8xf32>
    %215 = arith.mulf %213, %214 : vector<2x1x8xf32>
    %216 = arith.mulf %210, %210 : vector<2x1x8xf32>
    %217 = arith.subf %215, %216 : vector<2x1x8xf32>
    %cst_78 = arith.constant 9.99999974E-6 : f32
    %218 = vector.broadcast %cst_78 : f32 to vector<2x1x8xf32>
    %219 = arith.addf %217, %218 : vector<2x1x8xf32>
    %220 = math.rsqrt %219 : vector<2x1x8xf32>
    %221 = vector.broadcast %175 : vector<1x1x8xf32> to vector<2x1x8xf32>
    %222 = arith.mulf %221, %220 : vector<2x1x8xf32>
    %223 = arith.mulf %210, %222 : vector<2x1x8xf32>
    %224 = vector.broadcast %178 : vector<1x1x8xf32> to vector<2x1x8xf32>
    %225 = arith.subf %224, %223 : vector<2x1x8xf32>
    %226 = vector.broadcast %222 : vector<2x1x8xf32> to vector<2x8x8xf32>
    %227 = arith.mulf %183, %226 : vector<2x8x8xf32>
    %228 = vector.broadcast %225 : vector<2x1x8xf32> to vector<2x8x8xf32>
    %229 = arith.addf %227, %228 : vector<2x8x8xf32>
    %230 = arith.negf %229 : vector<2x8x8xf32>
    %231 = math.exp %230 : vector<2x8x8xf32>
    %cst_79 = arith.constant 1.000000e+00 : f32
    %232 = vector.broadcast %cst_79 : f32 to vector<2x8x8xf32>
    %233 = arith.addf %232, %231 : vector<2x8x8xf32>
    %234 = arith.divf %232, %233 : vector<2x8x8xf32>
    %235 = arith.mulf %206, %234 : vector<2x8x8xf32>
    %236 = arith.addf %162, %235 : vector<2x8x8xf32>
    %cst_80 = arith.constant 0.707106769 : f32
    %237 = vector.broadcast %cst_80 : f32 to vector<2x8x8xf32>
    %238 = arith.mulf %236, %237 : vector<2x8x8xf32>
    %239 = arith.addf %160, %238 : vector<2x8x8xf32>
    %240 = vector.extract_strided_slice %80 {offsets = [2, 0, 0, 0], sizes = [1, 2, 8, 8], strides = [1, 1, 1, 1]} : vector<3x2x8x8xf32> to vector<1x2x8x8xf32>
    %241 = vector.shape_cast %240 : vector<1x2x8x8xf32> to vector<2x8x8xf32>
    %242 = vector.extract_strided_slice %6 {offsets = [2, 0, 0, 0], sizes = [1, 1, 8, 8], strides = [1, 1, 1, 1]} : vector<3x1x8x8xf32> to vector<1x1x8x8xf32>
    %243 = vector.shape_cast %242 : vector<1x1x8x8xf32> to vector<8x8xf32>
    %244 = vector.extract_strided_slice %7 {offsets = [2, 0, 0, 0], sizes = [1, 1, 8, 8], strides = [1, 1, 1, 1]} : vector<3x1x8x8xf32> to vector<1x1x8x8xf32>
    %245 = vector.shape_cast %244 : vector<1x1x8x8xf32> to vector<8x8xf32>
    %246 = vector.extract_strided_slice %8 {offsets = [2, 0, 0], sizes = [1, 1, 8], strides = [1, 1, 1]} : vector<3x1x8xf32> to vector<1x1x8xf32>
    %247 = vector.shape_cast %246 : vector<1x1x8xf32> to vector<8xf32>
    %248 = vector.shape_cast %247 : vector<8xf32> to vector<1x1x8xf32>
    %249 = vector.extract_strided_slice %9 {offsets = [2, 0, 0], sizes = [1, 1, 8], strides = [1, 1, 1]} : vector<3x1x8xf32> to vector<1x1x8xf32>
    %250 = vector.shape_cast %249 : vector<1x1x8xf32> to vector<8xf32>
    %251 = vector.shape_cast %250 : vector<8xf32> to vector<1x1x8xf32>
    %252 = vector.extract_strided_slice %10 {offsets = [2, 0, 0], sizes = [1, 1, 8], strides = [1, 1, 1]} : vector<3x1x8xf32> to vector<1x1x8xf32>
    %253 = vector.shape_cast %252 : vector<1x1x8xf32> to vector<8xf32>
    %254 = vector.shape_cast %253 : vector<8xf32> to vector<1x1x8xf32>
    %255 = vector.extract_strided_slice %11 {offsets = [2, 0, 0], sizes = [1, 1, 8], strides = [1, 1, 1]} : vector<3x1x8xf32> to vector<1x1x8xf32>
    %256 = vector.shape_cast %255 : vector<1x1x8xf32> to vector<8xf32>
    %257 = vector.shape_cast %256 : vector<8xf32> to vector<1x1x8xf32>
    %258 = vector.shape_cast %241 : vector<2x8x8xf32> to vector<16x8xf32>
    %cst_81 = arith.constant dense<0.000000e+00> : vector<16x8xf32>
    %259 = tpu.matmul %258, %243, %cst_81 {dimension_numbers = #tpu.dot_dimension_numbers<[1], [0], [0], [1], [0, 0, 1, 1], [], []>} : vector<16x8xf32>, vector<8x8xf32>, vector<16x8xf32> -> vector<16x8xf32>
    %260 = vector.shape_cast %259 : vector<16x8xf32> to vector<2x8x8xf32>
    %cst_82 = arith.constant dense<0.000000e+00> : vector<16x8xf32>
    %261 = tpu.matmul %258, %245, %cst_82 {dimension_numbers = #tpu.dot_dimension_numbers<[1], [0], [0], [1], [0, 0, 1, 1], [], []>} : vector<16x8xf32>, vector<8x8xf32>, vector<16x8xf32> -> vector<16x8xf32>
    %262 = vector.shape_cast %261 : vector<16x8xf32> to vector<2x8x8xf32>
    %cst_83 = arith.constant dense<0.000000e+00> : vector<2x8xf32>
    %263 = vector.multi_reduction <add>, %260, %cst_83 [1] : vector<2x8x8xf32> to vector<2x8xf32>
    %264 = vector.shape_cast %263 : vector<2x8xf32> to vector<2x1x8xf32>
    %cst_84 = arith.constant 1.250000e-01 : f32
    %265 = vector.broadcast %cst_84 : f32 to vector<2x1x8xf32>
    %266 = arith.mulf %264, %265 : vector<2x1x8xf32>
    %267 = arith.mulf %260, %260 : vector<2x8x8xf32>
    %cst_85 = arith.constant dense<0.000000e+00> : vector<2x8xf32>
    %268 = vector.multi_reduction <add>, %267, %cst_85 [1] : vector<2x8x8xf32> to vector<2x8xf32>
    %269 = vector.shape_cast %268 : vector<2x8xf32> to vector<2x1x8xf32>
    %cst_86 = arith.constant 1.250000e-01 : f32
    %270 = vector.broadcast %cst_86 : f32 to vector<2x1x8xf32>
    %271 = arith.mulf %269, %270 : vector<2x1x8xf32>
    %272 = arith.mulf %266, %266 : vector<2x1x8xf32>
    %273 = arith.subf %271, %272 : vector<2x1x8xf32>
    %cst_87 = arith.constant 9.99999974E-6 : f32
    %274 = vector.broadcast %cst_87 : f32 to vector<2x1x8xf32>
    %275 = arith.addf %273, %274 : vector<2x1x8xf32>
    %276 = math.rsqrt %275 : vector<2x1x8xf32>
    %277 = vector.broadcast %248 : vector<1x1x8xf32> to vector<2x1x8xf32>
    %278 = arith.mulf %277, %276 : vector<2x1x8xf32>
    %279 = arith.mulf %266, %278 : vector<2x1x8xf32>
    %280 = vector.broadcast %251 : vector<1x1x8xf32> to vector<2x1x8xf32>
    %281 = arith.subf %280, %279 : vector<2x1x8xf32>
    %282 = vector.broadcast %278 : vector<2x1x8xf32> to vector<2x8x8xf32>
    %283 = arith.mulf %260, %282 : vector<2x8x8xf32>
    %284 = vector.broadcast %281 : vector<2x1x8xf32> to vector<2x8x8xf32>
    %285 = arith.addf %283, %284 : vector<2x8x8xf32>
    %cst_88 = arith.constant dense<0.000000e+00> : vector<2x8xf32>
    %286 = vector.multi_reduction <add>, %262, %cst_88 [1] : vector<2x8x8xf32> to vector<2x8xf32>
    %287 = vector.shape_cast %286 : vector<2x8xf32> to vector<2x1x8xf32>
    %cst_89 = arith.constant 1.250000e-01 : f32
    %288 = vector.broadcast %cst_89 : f32 to vector<2x1x8xf32>
    %289 = arith.mulf %287, %288 : vector<2x1x8xf32>
    %290 = arith.mulf %262, %262 : vector<2x8x8xf32>
    %cst_90 = arith.constant dense<0.000000e+00> : vector<2x8xf32>
    %291 = vector.multi_reduction <add>, %290, %cst_90 [1] : vector<2x8x8xf32> to vector<2x8xf32>
    %292 = vector.shape_cast %291 : vector<2x8xf32> to vector<2x1x8xf32>
    %cst_91 = arith.constant 1.250000e-01 : f32
    %293 = vector.broadcast %cst_91 : f32 to vector<2x1x8xf32>
    %294 = arith.mulf %292, %293 : vector<2x1x8xf32>
    %295 = arith.mulf %289, %289 : vector<2x1x8xf32>
    %296 = arith.subf %294, %295 : vector<2x1x8xf32>
    %cst_92 = arith.constant 9.99999974E-6 : f32
    %297 = vector.broadcast %cst_92 : f32 to vector<2x1x8xf32>
    %298 = arith.addf %296, %297 : vector<2x1x8xf32>
    %299 = math.rsqrt %298 : vector<2x1x8xf32>
    %300 = vector.broadcast %254 : vector<1x1x8xf32> to vector<2x1x8xf32>
    %301 = arith.mulf %300, %299 : vector<2x1x8xf32>
    %302 = arith.mulf %289, %301 : vector<2x1x8xf32>
    %303 = vector.broadcast %257 : vector<1x1x8xf32> to vector<2x1x8xf32>
    %304 = arith.subf %303, %302 : vector<2x1x8xf32>
    %305 = vector.broadcast %301 : vector<2x1x8xf32> to vector<2x8x8xf32>
    %306 = arith.mulf %262, %305 : vector<2x8x8xf32>
    %307 = vector.broadcast %304 : vector<2x1x8xf32> to vector<2x8x8xf32>
    %308 = arith.addf %306, %307 : vector<2x8x8xf32>
    %309 = arith.negf %308 : vector<2x8x8xf32>
    %310 = math.exp %309 : vector<2x8x8xf32>
    %cst_93 = arith.constant 1.000000e+00 : f32
    %311 = vector.broadcast %cst_93 : f32 to vector<2x8x8xf32>
    %312 = arith.addf %311, %310 : vector<2x8x8xf32>
    %313 = arith.divf %311, %312 : vector<2x8x8xf32>
    %314 = arith.mulf %285, %313 : vector<2x8x8xf32>
    %315 = arith.addf %241, %314 : vector<2x8x8xf32>
    %cst_94 = arith.constant 0.707106769 : f32
    %316 = vector.broadcast %cst_94 : f32 to vector<2x8x8xf32>
    %317 = arith.mulf %315, %316 : vector<2x8x8xf32>
    %318 = arith.addf %239, %317 : vector<2x8x8xf32>
    %319 = vector.shape_cast %318 : vector<2x8x8xf32> to vector<16x8xf32>
    %c0_95 = arith.constant 0 : index
    %c0_96 = arith.constant 0 : index
    %320 = vector.load %arg14[%c0_95, %c0_96] : memref<32x8xf32, #tpu.memory_space<vmem>>, vector<32x8xf32>
    %cst_97 = arith.constant dense<0.000000e+00> : vector<32x16xf32>
    %321 = tpu.matmul %320, %319, %cst_97 {dimension_numbers = #tpu.dot_dimension_numbers<[1], [1], [0], [0], [0, 0, 1, 0], [], []>} : vector<32x8xf32>, vector<16x8xf32>, vector<32x16xf32> -> vector<32x16xf32>
    %c0_98 = arith.constant 0 : index
    %c0_99 = arith.constant 0 : index
    %322 = vector.load %arg15[%c0_98, %c0_99] : memref<32x16xf32, #tpu.memory_space<vmem>>, vector<32x16xf32>
    tpu.vector_store %arg15[%c0_98, %c0_99], %321 {strides = array<i32>} : memref<32x16xf32, #tpu.memory_space<vmem>>, vector<32x16xf32>,
    return
  }
  func.func @transform_0(%arg0: i32) -> (i32, i32, i32) {
    %c0_i32 = arith.constant 0 : i32
    %c0_i32_0 = arith.constant 0 : i32
    %c0_i32_1 = arith.constant 0 : i32
    return %c0_i32, %arg0, %c0_i32_0 : i32, i32, i32
  }
  func.func @transform_1(%arg0: i32) -> (i32, i32, i32) {
    %c0_i32 = arith.constant 0 : i32
    %c0_i32_0 = arith.constant 0 : i32
    %c0_i32_1 = arith.constant 0 : i32
    %c0_i32_2 = arith.constant 0 : i32
    return %c0_i32, %c0_i32_0, %c0_i32_1 : i32, i32, i32
  }
  func.func @transform_2(%arg0: i32) -> (i32, i32, i32) {
    %c0_i32 = arith.constant 0 : i32
    %c0_i32_0 = arith.constant 0 : i32
    %c0_i32_1 = arith.constant 0 : i32
    %c0_i32_2 = arith.constant 0 : i32
    return %c0_i32, %c0_i32_0, %c0_i32_1 : i32, i32, i32
  }
  func.func @transform_3(%arg0: i32) -> (i32, i32, i32) {
    %c0_i32 = arith.constant 0 : i32
    %c0_i32_0 = arith.constant 0 : i32
    %c0_i32_1 = arith.constant 0 : i32
    %c0_i32_2 = arith.constant 0 : i32
    return %c0_i32, %c0_i32_0, %c0_i32_1 : i32, i32, i32
  }
  func.func @transform_4(%arg0: i32) -> (i32, i32, i32) {
    %c0_i32 = arith.constant 0 : i32
    %c0_i32_0 = arith.constant 0 : i32
    %c0_i32_1 = arith.constant 0 : i32
    %c0_i32_2 = arith.constant 0 : i32
    return %c0_i32, %c0_i32_0, %c0_i32_1 : i32, i32, i32
  }
  func.func @transform_5(%arg0: i32) -> (i32, i32, i32) {
    %c0_i32 = arith.constant 0 : i32
    %c0_i32_0 = arith.constant 0 : i32
    %c0_i32_1 = arith.constant 0 : i32
    %c0_i32_2 = arith.constant 0 : i32
    return %c0_i32, %c0_i32_0, %c0_i32_1 : i32, i32, i32
  }
  func.func @transform_6(%arg0: i32) -> (i32, i32, i32) {
    %c0_i32 = arith.constant 0 : i32
    %c0_i32_0 = arith.constant 0 : i32
    %c0_i32_1 = arith.constant 0 : i32
    %c0_i32_2 = arith.constant 0 : i32
    return %c0_i32, %c0_i32_0, %c0_i32_1 : i32, i32, i32
  }
  func.func @transform_7(%arg0: i32) -> (i32, i32, i32, i32) {
    %c0_i32 = arith.constant 0 : i32
    %c0_i32_0 = arith.constant 0 : i32
    %c0_i32_1 = arith.constant 0 : i32
    %c0_i32_2 = arith.constant 0 : i32
    %c0_i32_3 = arith.constant 0 : i32
    return %c0_i32, %c0_i32_0, %c0_i32_1, %c0_i32_2 : i32, i32, i32, i32
  }
  func.func @transform_8(%arg0: i32) -> (i32, i32, i32, i32) {
    %c0_i32 = arith.constant 0 : i32
    %c0_i32_0 = arith.constant 0 : i32
    %c0_i32_1 = arith.constant 0 : i32
    %c0_i32_2 = arith.constant 0 : i32
    %c0_i32_3 = arith.constant 0 : i32
    return %c0_i32, %c0_i32_0, %c0_i32_1, %c0_i32_2 : i32, i32, i32, i32
  }
  func.func @transform_9(%arg0: i32) -> (i32, i32, i32) {
    %c0_i32 = arith.constant 0 : i32
    %c0_i32_0 = arith.constant 0 : i32
    %c0_i32_1 = arith.constant 0 : i32
    %c0_i32_2 = arith.constant 0 : i32
    return %c0_i32, %c0_i32_0, %c0_i32_1 : i32, i32, i32
  }
  func.func @transform_10(%arg0: i32) -> (i32, i32, i32) {
    %c0_i32 = arith.constant 0 : i32
    %c0_i32_0 = arith.constant 0 : i32
    %c0_i32_1 = arith.constant 0 : i32
    %c0_i32_2 = arith.constant 0 : i32
    return %c0_i32, %c0_i32_0, %c0_i32_1 : i32, i32, i32
  }
  func.func @transform_11(%arg0: i32) -> (i32, i32, i32) {
    %c0_i32 = arith.constant 0 : i32
    %c0_i32_0 = arith.constant 0 : i32
    %c0_i32_1 = arith.constant 0 : i32
    %c0_i32_2 = arith.constant 0 : i32
    return %c0_i32, %c0_i32_0, %c0_i32_1 : i32, i32, i32
  }
  func.func @transform_12(%arg0: i32) -> (i32, i32, i32) {
    %c0_i32 = arith.constant 0 : i32
    %c0_i32_0 = arith.constant 0 : i32
    %c0_i32_1 = arith.constant 0 : i32
    %c0_i32_2 = arith.constant 0 : i32
    return %c0_i32, %c0_i32_0, %c0_i32_1 : i32, i32, i32
  }
  func.func @transform_13(%arg0: i32) -> (i32, i32) {
    %c0_i32 = arith.constant 0 : i32
    %c0_i32_0 = arith.constant 0 : i32
    %c0_i32_1 = arith.constant 0 : i32
    return %c0_i32, %c0_i32_0 : i32, i32
  }
  func.func @transform_14(%arg0: i32) -> (i32, i32) {
    %c0_i32 = arith.constant 0 : i32
    %c0_i32_0 = arith.constant 0 : i32
    return %c0_i32, %arg0 : i32, i32
  }
}

</mosaic_0001>

<bundles_post_ra>
// kernel: tabnet_decoder_forward.1
= control target key start
LH: loop header
LB: loop body
LE: loop exit
PB: predicated region body
PF: predicated region fallthrough
CT: control target
= control target key end

     0   :  { %vm85_vm0 = vcmask 64512   ;;  %vm1883_vm1 = vcmask 130048   ;;  %s2877_s1 = inlined_call_operand.vmem [shape: f32[1,8,8], index: 1, kind: input, shape index: {}]   ;;  %s2878_s0 = inlined_call_operand.vmem [shape: f32[3,16,8], index: 0, kind: input, shape index: {}]   ;;  %s2879_s2 = inlined_call_operand.vmem [shape: f32[1,8,8], index: 2, kind: input, shape index: {}]   ;;  %s2880_s8 = inlined_call_operand.vmem [shape: f32[3,1,8,8], index: 8, kind: input, shape index: {}]   ;;  %s2881_s7 = inlined_call_operand.vmem [shape: f32[3,1,8,8], index: 7, kind: input, shape index: {}]   ;;  %s2882_s5 = inlined_call_operand.vmem [shape: f32[3,1,8], index: 5, kind: input, shape index: {}]   ;;  %s2883_s6 = inlined_call_operand.vmem [shape: f32[3,1,8], index: 6, kind: input, shape index: {}]   ;;  %s2884_s3 = inlined_call_operand.vmem [shape: f32[3,1,8], index: 3, kind: input, shape index: {}]   ;;  %s2885_s4 = inlined_call_operand.vmem [shape: f32[3,1,8], index: 4, kind: input, shape index: {}]   ;;  %s2886_s13 = inlined_call_operand.vmem [shape: f32[32,8], index: 13, kind: input, shape index: {}]   ;;  %s2887_s11 = inlined_call_operand.vmem [shape: f32[3,1,8], index: 11, kind: input, shape index: {}]   ;;  %s2888_s12 = inlined_call_operand.vmem [shape: f32[3,1,8], index: 12, kind: input, shape index: {}]   ;;  %s2889_s9 = inlined_call_operand.vmem [shape: f32[3,1,8], index: 9, kind: input, shape index: {}]   ;;  %s2890_s10 = inlined_call_operand.vmem [shape: f32[3,1,8], index: 10, kind: input, shape index: {}]   ;;  %s2891_s14 = inlined_call_operand.vmem [shape: f32[32,16], index: 14, kind: output, shape index: {}]  }
   0x1   :  { %v47_v0 = vld [vmem:[%s2877_s1] sm:$0xff]  ;;  %v81_v2 = vld [vmem:[%s2878_s0 + $0x10] sm:$0xff]  ;;  %v80_v3 = vld [vmem:[%s2878_s0 + $0x8] sm:$0xff] }
   0x2   :  { %v79_v1 = vld [vmem:[%s2878_s0] sm:$0xff]  ;;  %1972 = vmatprep.subr.mxu0 %v47_v0  ;;  %2034 = vmatprep.subr.mxu1 %v47_v0  ;;  %v82_v4 = vld [vmem:[%s2878_s0 + $0x18] sm:$0xff]  ;;  %v84_v7 = vld [vmem:[%s2878_s0 + $0x28] sm:$0xff] }
   0x3   :  { %1973 = vmatpush3.msra.mxu0 %v47_v0  ;;  %2035 = vmatpush3.msra.mxu1 %v47_v0  ;;  %v48_v5 = vld [vmem:[%s2879_s2] sm:$0xff]  ;;  %v2252_v10 = vld [vmem:[%s2880_s8 + $0x8] sm:$0xff] }
   0x4   :  { %v83_v6 = vld [vmem:[%s2878_s0 + $0x20] sm:$0xff]  ;;  %1974 = vmatprep.mubr.msk.f32.mxu0 %vm85_vm0, %v79_v1  ;;  %1977 = vmatprep.mubr.msk.f32.mxu1 %vm85_vm0, %v81_v2  ;;  %v2257_v11 = vld [vmem:[%s2881_s7 + $0x8] sm:$0xff] }
   0x5   :  { %1975 = vmatmul.mubr.msk.f32.vlgmr.msra.gmra.mxu0 %vm85_vm0, %v80_v3  ;;  %1978 = vmatmul.mubr.msk.f32.vlgmr.msra.gmra.mxu1 %vm85_vm0, %v82_v4  ;;  %v64_v8 = vld [vmem:[%s2880_s8] sm:$0xff] }
   0x6   :  { %1983 = vmatprep.subr.mxu1 %v48_v5  ;;  %1980 = vmatprep.mubr.msk.f32.mxu1 %vm85_vm0, %v83_v6  ;;  %v61_v9 = vld [vmem:[%s2881_s7] sm:$0xff] }
   0x7   :  { %1984 = vmatpush3.msra.mxu1 %v48_v5  ;;  %1994 = vmatprep.subr.mxu0 %v61_v9 }
   0x8   :  { %1999 = vmatprep.subr.mxu1 %v64_v8  ;;  %1995 = vmatpush3.msra.mxu0 %v61_v9 }
   0x9   :  { %1981 = vmatmul.mubr.msk.f32.gmra.mxu1 %vm85_vm0, %v84_v7  ;;  %2004 = vmatprep.subr.mxu0 %v2257_v11 }
   0xa   :  { %1985 = vmatprep.mubr.msk.f32.mxu1 %vm85_vm0, %v79_v1 }
   0xd   :  { %1986 = vmatmul.mubr.msk.f32.vlgmr.msra.gmra.mxu1 %vm85_vm0, %v80_v3 }
   0xe   :  { %1988 = vmatprep.mubr.msk.f32.mxu1 %vm85_vm0, %v81_v2  ;;  %2000 = vmatpush3.msra.mxu1 %v64_v8 }
   0xf   :  { %2009 = vmatprep.subr.mxu1 %v2252_v10 }
  0x11   :  { %1989 = vmatmul.mubr.msk.f32.gmra.mxu1 %vm85_vm0, %v82_v4 }
  0x12   :  { %1991 = vmatprep.mubr.msk.f32.mxu1 %vm85_vm0, %v83_v6 }
  0x15   :  { %1992 = vmatmul.mubr.msk.f32.gmra.mxu1 %vm85_vm0, %v84_v7 }
  0xc5   :  { %v2259_v12 = vpop.f32.mrf.mxu1  ;;  %v2265_v14 = vpop.f32.mrf.mxu0 }
  0xc6   :  { %v343_v16 = vmul.f32 %v2265_v14, %v2265_v14  ;;  %v301_v17 = vsel %vm85_vm0, %v2265_v14, 0.0  ;;  %v315_v18 = vsel %vm85_vm0, %v2259_v12, 0.0  ;;  %v345_v19 = vmul.f32 %v2259_v12, %v2259_v12 }
  0xc7   :  { %v2263_v13 = vpop.f32.mrf.mxu1  ;;  %v302_v21 = vrot.slane %v301_v17, 4  ;;  %v2280_v23 = vpop.f32.mrf.mxu0  ;;  %v316_v24 = vrot.slane %v315_v18, 4 }
  0xc8   :  { %v355_v22 = vsel %vm85_vm0, %v343_v16, 0.0  ;;  %v369_v25 = vsel %vm85_vm0, %v345_v19, 0.0  ;;  %v294_v28 = vsel %vm85_vm0, %v2280_v23, 0.0  ;;  %v342_v29 = vmul.f32 %v2280_v23, %v2280_v23 }
  0xc9   :  { %v2267_v15 = vpop.f32.mrf.mxu1  ;;  %v356_v27 = vrot.slane %v355_v22, 4  ;;  %v303_v30 = vadd.f32 %v302_v21, %v301_v17  ;;  %v317_v31 = vadd.f32 %v316_v24, %v315_v18  ;;  %v370_v32 = vrot.slane %v369_v25, 4 }
  0xca   :  { %v295_v33 = vrot.slane %v294_v28, 4  ;;  %v348_v37 = vsel %vm85_vm0, %v342_v29, 0.0  ;;  %v308_v38 = vsel %vm85_vm0, %v2263_v13, 0.0  ;;  %v344_v40 = vmul.f32 %v2263_v13, %v2263_v13 }
  0xcb   :  { %v2277_v20 = vpop.f32.mrf.mxu1  ;;  %v357_v36 = vadd.f32 %v356_v27, %v355_v22  ;;  %v304_v39 = vrot.slane %v303_v30, 2  ;;  %v318_v43 = vrot.slane %v317_v31, 2  ;;  %v371_v44 = vadd.f32 %v370_v32, %v369_v25 }
  0xcc   :  { %v296_v46 = vadd.f32 %v295_v33, %v294_v28  ;;  %v349_v47 = vrot.slane %v348_v37, 4  ;;  %v309_v51 = vrot.slane %v308_v38, 4  ;;  %v362_v55 = vsel %vm85_vm0, %v344_v40, 0.0 }
  0xcd   :  { %v2283_v26 = vpop.f32.mrf.mxu1  ;;  %v358_v50 = vrot.slane %v357_v36, 2  ;;  %v305_v54 = vadd.f32 %v304_v39, %v303_v30  ;;  %v319_v57 = vadd.f32 %v318_v43, %v317_v31  ;;  %v372_v58 = vrot.slane %v371_v44, 2 }
  0xce   :  { %v529_v34 = vsel %vm85_vm0, %v2283_v26, 0.0  ;;  %v571_v42 = vmul.f32 %v2283_v26, %v2283_v26  ;;  %v297_v61 = vrot.slane %v296_v46, 2  ;;  %v350_v62 = vadd.f32 %v349_v47, %v348_v37 }
  0xcf   :  { %v2291_v35 = vpop.f32.mrf.mxu1  ;;  %v530_v41 = vrot.slane %v529_v34, 4  ;;  %v359_v0 = vadd.f32 %v358_v50, %v357_v36  ;;  %v310_v1 = vadd.f32 %v309_v51, %v308_v38  ;;  %v363_v2 = vrot.slane %v362_v55, 4 }
  0xd0   :  { %v522_v45 = vsel %vm85_vm0, %v2291_v35, 0.0  ;;  %v583_v49 = vsel %vm85_vm0, %v571_v42, 0.0  ;;  %v306_v4 = vrot.slane %v305_v54, 1  ;;  %v320_v7 = vrot.slane %v319_v57, 1 }
  0xd1   :  { %v531_v48 = vadd.f32 %v530_v41, %v529_v34  ;;  %v584_v52 = vrot.slane %v583_v49, 4  ;;  %v523_v53 = vrot.slane %v522_v45, 4  ;;  %v373_v8 = vadd.f32 %v372_v58, %v371_v44  ;;  %v2309_v38 = vpop.f32.mrf.mxu1 }
  0xd2   :  { %v570_v16 = vmul.f32 %v2291_v35, %v2291_v35  ;;  %v444_v17 = vlaneseq  ;;  %v298_v18 = vadd.f32 %v297_v61, %v296_v46  ;;  %v351_v19 = vrot.slane %v350_v62, 2 }
  0xd3   :  { %v532_v56 = vrot.slane %v531_v48, 2  ;;  %v585_v59 = vadd.f32 %v584_v52, %v583_v49  ;;  %v524_v60 = vadd.f32 %v523_v53, %v522_v45  ;;  %v360_v22 = vrot.slane %v359_v0, 1  ;;  %v2321_v53 = vpop.f32.mrf.mxu1 }
  0xd4   :  { %v311_v24 = vrot.slane %v310_v1, 2  ;;  %v364_v25 = vadd.f32 %v363_v2, %v362_v55  ;;  %v307_v27 = vadd.f32 %v306_v4, %v305_v54  ;;  %v321_v30 = vadd.f32 %v320_v7, %v319_v57 }
  0xd5   :  { %v533_v63 = vadd.f32 %v532_v56, %v531_v48  ;;  %v586_v3 = vrot.slane %v585_v59, 2  ;;  %v525_v6 = vrot.slane %v524_v60, 2  ;;  %v374_v31 = vrot.slane %v373_v8, 1 }
  0xd6   :  { %v576_v33 = vsel %vm85_vm0, %v570_v16, 0.0  ;;  %v445_v34 = vshrl.u32 %v444_v17, 7  ;;  %v299_v36 = vrot.slane %v298_v18, 1  ;;  %v352_v37 = vadd.f32 %v351_v19, %v350_v62 }
  0xd7   :  { %v534_v5 = vrot.slane %v533_v63, 1  ;;  %v587_v9 = vadd.f32 %v586_v3, %v585_v59  ;;  %v526_v29 = vadd.f32 %v525_v6, %v524_v60  ;;  %v361_v39 = vadd.f32 %v360_v22, %v359_v0  ;;  %v2343_v6 = vpop.f32.mrf.mxu1 }
  0xd8   :  { %v312_v40 = vadd.f32 %v311_v24, %v310_v1  ;;  %v365_v41 = vrot.slane %v364_v25, 2  ;;  %v2311_v42 = vmul.f32 0.125, %v307_v27  ;;  %v577_v45 = vrot.slane %v576_v33, 4 }
  0xd9   :  { %v535_v21 = vadd.f32 %v534_v5, %v533_v63  ;;  %v588_v28 = vrot.slane %v587_v9, 1  ;;  %v527_v44 = vrot.slane %v526_v29, 1  ;;  %v2313_v46 = vmul.f32 0.125, %v321_v30 }
  0xda   :  { %v375_v47 = vadd.f32 %v374_v31, %v373_v8  ;;  %v543_v49 = vsel %vm85_vm0, %v2309_v38, 0.0  ;;  %v2319_v50 = vsub.s32 0, %v445_v34  ;;  %v300_v51 = vadd.f32 %v299_v36, %v298_v18 }
  0xdb   :  { %v2306_v32 = vmul.f32 0.125, %v535_v21  ;;  %v589_v43 = vadd.f32 %v588_v28, %v587_v9  ;;  %v353_v52 = vrot.slane %v352_v37, 1  ;;  %v2323_v54 = vmul.f32 0.125, %v361_v39 }
  0xdc   :  { %v313_v55 = vrot.slane %v312_v40, 1  ;;  %v2325_v56 = vadd.f32 %v365_v41, %v364_v25  ;;  %v2329_v58 = vmul.f32 %v2311_v42, %v2311_v42  ;;  %v528_v59 = vadd.f32 %v527_v44, %v526_v29 }
  0xdd   :  { %v625_v48 = vmul.f32 %v2306_v32, %v2306_v32  ;;  %v619_v57 = vmul.f32 0.125, %v589_v43  ;;  %v578_v60 = vadd.f32 %v577_v45, %v576_v33  ;;  %v544_v61 = vrot.slane %v543_v49, 4 }
  0xde   :  { %v2331_v62 = vmul.f32 0.125, %v375_v47  ;;  %v2335_v63 = vmul.f32 %v2313_v46, %v2313_v46  ;;  %v573_v1 = vmul.f32 %v2309_v38, %v2309_v38  ;;  %v2339_v2 = vmul.f32 0.125, %v300_v51 }
  0xdf   :  { %v631_v0 = vsub.f32 %v619_v57, %v625_v48  ;;  %v579_v3 = vrot.slane %v578_v60, 2  ;;  %v545_v4 = vadd.f32 %v544_v61, %v543_v49  ;;  %v536_v5 = vsel %vm85_vm0, %v2321_v53, 0.0  ;;  %v2366_v61 = vpop.f32.mrf.mxu1 }
  0xe0   :  { %v354_v7 = vadd.f32 %v353_v52, %v352_v37  ;;  %v597_v9 = vsel %vm85_vm0, %v573_v1, 0.0  ;;  %v537_v16 = vrot.slane %v536_v5, 4  ;;  %v2346_v17 = vmul.f32 0.125, %v528_v59 }
  0xe1   :  { %v637_v8 = vadd.f32 1e-05, %v631_v0  ;;  %v580_v18 = vadd.f32 %v579_v3, %v578_v60  ;;  %v546_v19 = vrot.slane %v545_v4, 2  ;;  %v598_v21 = vrot.slane %v597_v9, 4 }
  0xe2   :  { %v538_v22 = vadd.f32 %v537_v16, %v536_v5  ;;  %v572_v24 = vmul.f32 %v2321_v53, %v2321_v53  ;;  %v557_v25 = vsel %vm85_vm0, %v2343_v6, 0.0  ;;  %v2352_v31 = vadd.f32 %v313_v55, %v312_v40 }
  0xe3   :  { %2036 = vrsqrt.f32 %v637_v8  ;;  %v581_v27 = vrot.slane %v580_v18, 1  ;;  %v547_v28 = vadd.f32 %v546_v19, %v545_v4  ;;  %v599_v29 = vadd.f32 %v598_v21, %v597_v9 }
  0xe4   :  { %v558_v30 = vrot.slane %v557_v25, 4  ;;  %v347_v33 = vmul.f32 %v2267_v15, %v2267_v15  ;;  %v539_v34 = vrot.slane %v538_v22, 2  ;;  %v590_v36 = vsel %vm85_vm0, %v572_v24, 0.0 }
  0xe5   :  { %v582_v37 = vadd.f32 %v581_v27, %v580_v18  ;;  %v624_v39 = vmul.f32 %v2346_v17, %v2346_v17  ;;  %v548_v41 = vrot.slane %v547_v28, 1  ;;  %v600_v43 = vrot.slane %v599_v29, 2 }
  0xe6   :  { %v329_v44 = vsel %vm85_vm0, %v2267_v15, 0.0  ;;  %v540_v45 = vadd.f32 %v539_v34, %v538_v22  ;;  %v591_v47 = vrot.slane %v590_v36, 4  ;;  %v559_v48 = vadd.f32 %v558_v30, %v557_v25 }
  0xe7   :  { %v367_v40 = vrot.slane %v2325_v56, 1  ;;  %v618_v49 = vmul.f32 0.125, %v582_v37  ;;  %v549_v51 = vadd.f32 %v548_v41, %v547_v28  ;;  %v575_v52 = vmul.f32 %v2343_v6, %v2343_v6 }
  0xe8   :  { %v2364_v55 = vmul.f32 0.125, %v354_v7  ;;  %v601_v57 = vadd.f32 %v600_v43, %v599_v29  ;;  %v541_v59 = vrot.slane %v540_v45, 1  ;;  %v592_v60 = vadd.f32 %v591_v47, %v590_v36 }
  0xe9   :  { %v330_v0 = vrot.slane %v329_v44, 4  ;;  %v2369_v1 = vsel %vm85_vm0, %v347_v33, 0.0  ;;  %v630_v3 = vsub.f32 %v618_v49, %v624_v39  ;;  %v560_v4 = vrot.slane %v559_v48, 2  ;;  %v55_v33 = vld [vmem:[%s2882_s5] sm:$0x1] }
  0xea   :  { %v2371_v5 = vmul.f32 0.125, %v549_v51  ;;  %v602_v8 = vrot.slane %v601_v57, 1  ;;  %v542_v9 = vadd.f32 %v541_v59, %v540_v45  ;;  %v593_v16 = vrot.slane %v592_v60, 2 }
  0xeb   :  { %v2375_v7 = vmul.f32 %v2339_v2, %v2339_v2  ;;  %v636_v18 = vadd.f32 1e-05, %v630_v3  ;;  %v611_v19 = vsel %vm85_vm0, %v575_v52, 0.0  ;;  %v550_v21 = vsel %vm85_vm0, %v2366_v61, 0.0 }
  0xec   :  { %v603_v22 = vadd.f32 %v602_v8, %v601_v57  ;;  %v627_v24 = vmul.f32 %v2371_v5, %v2371_v5  ;;  %v2382_v25 = vmul.f32 0.125, %v542_v9  ;;  %v594_v27 = vadd.f32 %v593_v16, %v592_v60  ;;  %v2401_v60 = vld [vmem:[%s2883_s6] sm:$0x1] }
  0xed   :  { %v2384_v28 = vadd.f32 %v330_v0, %v329_v44  ;;  %v384_v29 = vrot.slane %v2369_v1, 4  ;;  %v322_v30 = vsel %vm85_vm0, %v2277_v20, 0.0  ;;  %2038 = vrsqrt.f32 %v636_v18 }
  0xee   :  { %v346_v34 = vmul.f32 %v2277_v20, %v2277_v20  ;;  %v621_v36 = vmul.f32 0.125, %v603_v22  ;;  %v595_v37 = vrot.slane %v594_v27, 1  ;;  %v561_v39 = vadd.f32 %v560_v4, %v559_v48 }
  0xef   :  { %v626_v43 = vmul.f32 %v2382_v25, %v2382_v25  ;;  %v612_v44 = vrot.slane %v611_v19, 4  ;;  %v551_v45 = vrot.slane %v550_v21, 4  ;;  %v574_v47 = vmul.f32 %v2366_v61, %v2366_v61 }
  0xf0   :  { %v2037_v41 = vpop.eup %2036  ;;  %v633_v51 = vsub.f32 %v621_v36, %v627_v24  ;;  %v596_v52 = vadd.f32 %v595_v37, %v594_v27  ;;  %v562_v57 = vrot.slane %v561_v39, 1  ;;  %v323_v59 = vrot.slane %v322_v30, 4 }
  0xf1   :  { %v649_v49 = vmul.f32 %v2037_v41, %v55_v33  ;;  %v613_v48 = vadd.f32 %v612_v44, %v611_v19  ;;  %v552_v0 = vadd.f32 %v551_v45, %v550_v21  ;;  %v604_v3 = vsel %vm85_vm0, %v574_v47, 0.0 }
  0xf2   :  { %v376_v4 = vsel %vm85_vm0, %v346_v34, 0.0  ;;  %v639_v9 = vadd.f32 1e-05, %v633_v51  ;;  %v620_v16 = vmul.f32 0.125, %v596_v52  ;;  %v563_v18 = vadd.f32 %v562_v57, %v561_v39 }
  0xf3   :  { %v655_v8 = vmul.f32 %v649_v49, %v2306_v32  ;;  %v614_v22 = vrot.slane %v613_v48, 2  ;;  %v553_v24 = vrot.slane %v552_v0, 2  ;;  %v605_v27 = vrot.slane %v604_v3, 4 }
  0xf4   :  { %v679_v37 = vrot.slane %v649_v49, %v2319_v50  ;;  %2040 = vrsqrt.f32 %v639_v9  ;;  %v632_v41 = vsub.f32 %v620_v16, %v626_v43  ;;  %v2408_v19 = vmul.f32 0.125, %v563_v18 }
  0xf5   :  { %v661_v36 = vsub.f32 %v2401_v60, %v655_v8  ;;  %v615_v21 = vadd.f32 %v614_v22, %v613_v48  ;;  %v554_v44 = vadd.f32 %v553_v24, %v552_v0  ;;  %v606_v45 = vadd.f32 %v605_v27, %v604_v3 }
  0xf6   :  { %v324_v34 = vadd.f32 %v323_v59, %v322_v30  ;;  %v377_v47 = vrot.slane %v376_v4, 4  ;;  %v638_v51 = vadd.f32 1e-05, %v632_v41  ;;  %v403_v39 = vsub.f32 %v2323_v54, %v2329_v58 }
  0xf7   :  { %v721_v32 = vrot.slane %v661_v36, %v2319_v50  ;;  %v616_v52 = vrot.slane %v615_v21, 1  ;;  %v555_v57 = vrot.slane %v554_v44, 1  ;;  %v607_v8 = vrot.slane %v606_v45, 2 }
  0xf8   :  { %v402_v49 = vsub.f32 %v2364_v55, %v2375_v7  ;;  %v385_v43 = vadd.f32 %v384_v29, %v2369_v1  ;;  %v703_v48 = vmul.f32 %v2283_v26, %v679_v37  ;;  %2042 = vrsqrt.f32 %v638_v51 }
  0xf9   :  { %v617_v0 = vadd.f32 %v616_v52, %v615_v21  ;;  %v629_v30 = vmul.f32 %v2408_v19, %v2408_v19  ;;  %v556_v59 = vadd.f32 %v555_v57, %v554_v44  ;;  %v608_v3 = vadd.f32 %v607_v8, %v606_v45 }
  0xfa   :  { %v2039_v9 = vpop.eup %2038  ;;  %v332_v54 = vrot.slane %v2384_v28, 2  ;;  %v325_v58 = vrot.slane %v324_v34, 2  ;;  %v378_v16 = vadd.f32 %v377_v47, %v376_v4  ;;  %v745_v18 = vadd.f32 %v721_v32, %v703_v48 }
  0xfb   :  { %v648_v22 = vmul.f32 %v2039_v9, %v55_v33  ;;  %v623_v24 = vmul.f32 0.125, %v617_v0  ;;  %v2420_v55 = vmul.f32 0.125, %v556_v59  ;;  %v609_v1 = vrot.slane %v608_v3, 1 }
  0xfc   :  { %v408_v7 = vadd.f32 1e-05, %v402_v49  ;;  %v2423_v26 = vmul.f32 0.125, %v2352_v31  ;;  %v368_v29 = vadd.f32 %v367_v40, %v2325_v56  ;;  %v386_v27 = vrot.slane %v385_v43, 2  ;;  %v56_v56 = vld [vmem:[%s2882_s5 + $0x1] sm:$0x1] }
  0xfd   :  { %v654_v36 = vmul.f32 %v648_v22, %v2346_v17  ;;  %v675_v37 = vrot.slane %v648_v22, %v2319_v50  ;;  %v635_v4 = vsub.f32 %v623_v24, %v629_v30  ;;  %v610_v41 = vadd.f32 %v609_v1, %v608_v3 }
  0xfe   :  { %v326_v33 = vadd.f32 %v325_v58, %v324_v34  ;;  %v379_v21 = vrot.slane %v378_v16, 2  ;;  %v1905_v44 = vmul.f32 -1.442695, %v745_v18  ;;  %v628_v45 = vmul.f32 %v2420_v55, %v2420_v55 }
  0xff   :  { %v333_v31 = vadd.f32 %v332_v54, %v2384_v28  ;;  %v660_v47 = vsub.f32 %v2401_v60, %v654_v36  ;;  %v641_v40 = vadd.f32 1e-05, %v635_v4  ;;  %v622_v17 = vmul.f32 0.125, %v610_v41 }
 0x100   :  { %v409_v32 = vadd.f32 1e-05, %v403_v39  ;;  %2044 = vrsqrt.f32 %v408_v7  ;;  %v392_v51 = vmul.f32 0.125, %v368_v29  ;;  %v398_v34 = vmul.f32 %v2423_v26, %v2423_v26  ;;  %v59_v39 = vld [vmem:[%s2883_s6 + $0x1] sm:$0x1] }
 0x101   :  { %v2041_v52 = vpop.eup %2040  ;;  %v702_v57 = vmul.f32 %v675_v37, %v2291_v35  ;;  %v717_v8 = vrot.slane %v660_v47, %v2319_v50  ;;  %2046 = vrsqrt.f32 %v641_v40  ;;  %v634_v28 = vsub.f32 %v622_v17, %v628_v45 }
 0x102   :  { %v327_v60 = vrot.slane %v326_v33, 1  ;;  %v380_v49 = vadd.f32 %v379_v21, %v378_v16  ;;  %2048 = vpow2.f32 %v1905_v44  ;;  %v651_v48 = vmul.f32 %v2041_v52, %v56_v56 }
 0x103   :  { %v334_v0 = vrot.slane %v333_v31, 1  ;;  %v387_v30 = vadd.f32 %v386_v27, %v385_v43  ;;  %v744_v59 = vadd.f32 %v717_v8, %v702_v57  ;;  %v640_v3 = vadd.f32 1e-05, %v634_v28  ;;  %v60_v28 = vld [vmem:[%s2883_s6 + $0x2] sm:$0x1] }
 0x104   :  { %2050 = vrsqrt.f32 %v409_v32  ;;  %v657_v9 = vmul.f32 %v651_v48, %v2371_v5  ;;  %v687_v35 = vrot.slane %v651_v48, %v2319_v50  ;;  %v404_v58 = vsub.f32 %v392_v51, %v398_v34 }
 0x105   :  { %v2043_v54 = vpop.eup %2042  ;;  %v1904_v18 = vmul.f32 -1.442695, %v744_v59  ;;  %2052 = vrsqrt.f32 %v640_v3  ;;  %v328_v16 = vadd.f32 %v327_v60, %v326_v33  ;;  %v381_v22 = vrot.slane %v380_v49, 1 }
 0x106   :  { %v663_v24 = vsub.f32 %v59_v39, %v657_v9  ;;  %v650_v1 = vmul.f32 %v2043_v54, %v56_v56  ;;  %v405_v43 = vsub.f32 %v2331_v62, %v2335_v63  ;;  %v335_v7 = vadd.f32 %v334_v0, %v333_v31 }
 0x107   :  { %v388_v29 = vrot.slane %v387_v30, 1  ;;  %2054 = vpow2.f32 %v1904_v18  ;;  %v705_v27 = vmul.f32 %v2309_v38, %v687_v35  ;;  %v410_v4 = vadd.f32 1e-05, %v404_v58 }
 0x108   :  { %v729_v5 = vrot.slane %v663_v24, %v2319_v50  ;;  %v656_v36 = vmul.f32 %v650_v1, %v2382_v25  ;;  %v683_v37 = vrot.slane %v650_v1, %v2319_v50  ;;  %v2452_v41 = vmul.f32 0.125, %v328_v16  ;;  %v57_v25 = vld [vmem:[%s2882_s5 + $0x2] sm:$0x1] }
 0x109   :  { %v382_v33 = vadd.f32 %v381_v22, %v380_v49  ;;  %v411_v45 = vadd.f32 1e-05, %v405_v43  ;;  %v389_v47 = vadd.f32 %v388_v29, %v387_v30  ;;  %v2454_v62 = vmul.f32 0.125, %v335_v7  ;;  %v49_v49 = vld [vmem:[%s2884_s3] sm:$0x1] }
 0x10a   :  { %v747_v21 = vadd.f32 %v729_v5, %v705_v27  ;;  %v662_v44 = vsub.f32 %v59_v39, %v656_v36  ;;  %v704_v31 = vmul.f32 %v683_v37, %v2321_v53  ;;  %2056 = vrsqrt.f32 %v410_v4 }
 0x10b   :  { %v394_v17 = vmul.f32 0.125, %v382_v33  ;;  %v400_v32 = vmul.f32 %v2452_v41, %v2452_v41  ;;  %v395_v57 = vmul.f32 0.125, %v389_v47  ;;  %v401_v53 = vmul.f32 %v2454_v62, %v2454_v62 }
 0x10c   :  { %v1907_v63 = vmul.f32 -1.442695, %v747_v21  ;;  %v725_v38 = vrot.slane %v662_v44, %v2319_v50 }
 0x10d   :  { %v2045_v56 = vpop.eup %2044  ;;  %v406_v59 = vsub.f32 %v394_v17, %v400_v32  ;;  %v407_v18 = vsub.f32 %v395_v57, %v401_v53 }
 0x10e   :  { %v2047_v40 = vpop.eup %2046  ;;  %2058 = vpow2.f32 %v1907_v63  ;;  %v746_v51 = vadd.f32 %v725_v38, %v704_v31  ;;  %v420_v3 = vmul.f32 %v2045_v56, %v49_v49  ;;  %v50_v63 = vld [vmem:[%s2884_s3 + $0x1] sm:$0x1] }
 0x10f   :  { %v2049_v34 = vpop.eup %2048  ;;  %2060 = vrsqrt.f32 %v411_v45  ;;  %v653_v52 = vmul.f32 %v2047_v40, %v57_v25  ;;  %v412_v43 = vadd.f32 1e-05, %v406_v59  ;;  %v413_v36 = vadd.f32 1e-05, %v407_v18 }
 0x110   :  { %v1906_v8 = vmul.f32 -1.442695, %v746_v51  ;;  %v769_v39 = vadd.f32 1.0, %v2049_v34  ;;  %v426_v7 = vmul.f32 %v420_v3, %v2339_v2  ;;  %v447_v31 = vrot.slane %v420_v3, %v2319_v50 }
 0x111   :  { %v2051_v60 = vpop.eup %2050  ;;  %v659_v48 = vmul.f32 %v653_v52, %v2408_v19  ;;  %v695_v0 = vrot.slane %v653_v52, %v2319_v50 }
 0x112   :  { %v2053_v30 = vpop.eup %2052  ;;  %2062 = vpow2.f32 %v1906_v8  ;;  %v421_v58 = vmul.f32 %v2051_v60, %v49_v49  ;;  %v474_v52 = vmul.f32 %v447_v31, %v2280_v23 }
 0x113   :  { %v665_v9 = vsub.f32 %v60_v28, %v659_v48  ;;  %v652_v35 = vmul.f32 %v2053_v30, %v57_v25  ;;  %v707_v16 = vmul.f32 %v2343_v6, %v695_v0  ;;  %2064 = vrcp.f32 %v769_v39  ;;  %v52_v6 = vld [vmem:[%s2885_s4] sm:$0x1]  ;;  %v53_v48 = vld [vmem:[%s2885_s4 + $0x1] sm:$0x1] }
 0x114   :  { %v2055_v54 = vpop.eup %2054  ;;  %v427_v5 = vmul.f32 %v421_v58, %v2311_v42  ;;  %v432_v44 = vsub.f32 %v52_v6, %v426_v7  ;;  %v451_v42 = vrot.slane %v421_v58, %v2319_v50 }
 0x115   :  { %v768_v22 = vadd.f32 1.0, %v2055_v54  ;;  %v737_v24 = vrot.slane %v665_v9, %v2319_v50  ;;  %v658_v1 = vmul.f32 %v652_v35, %v2420_v55  ;;  %v691_v19 = vrot.slane %v652_v35, %v2319_v50  ;;  %v51_v54 = vld [vmem:[%s2884_s3 + $0x2] sm:$0x1] }
 0x116   :  { %v433_v47 = vsub.f32 %v52_v6, %v427_v5  ;;  %v489_v17 = vrot.slane %v432_v44, %v2319_v50  ;;  %v475_v32 = vmul.f32 %v2265_v14, %v451_v42 }
 0x117   :  { %2066 = vrcp.f32 %v768_v22  ;;  %v749_v29 = vadd.f32 %v737_v24, %v707_v16  ;;  %v664_v27 = vsub.f32 %v60_v28, %v658_v1  ;;  %v706_v4 = vmul.f32 %v691_v19, %v2366_v61  ;;  %v2057_v33 = vpop.eup %2056 }
 0x118   :  { %2068 = vrsqrt.f32 %v412_v43  ;;  %v422_v25 = vmul.f32 %v2057_v33, %v50_v63  ;;  %v493_v51 = vrot.slane %v433_v47, %v2319_v50  ;;  %v516_v28 = vadd.f32 %v489_v17, %v474_v52 }
 0x119   :  { %v1909_v37 = vmul.f32 -1.442695, %v749_v29  ;;  %v733_v55 = vrot.slane %v664_v27, %v2319_v50 }
 0x11a   :  { %v428_v57 = vmul.f32 %v422_v25, %v2423_v26  ;;  %v517_v49 = vadd.f32 %v493_v51, %v475_v32  ;;  %v63_v26 = vld [vmem:[%s2881_s7 + $0x10] sm:$0xff]  ;;  %v455_v3 = vrot.slane %v422_v25, %v2319_v50 }
 0x11b   :  { %v2059_v21 = vpop.eup %2058  ;;  %2070 = vpow2.f32 %v1909_v37  ;;  %v748_v2 = vadd.f32 %v733_v55, %v706_v4 }
 0x11c   :  { %v2061_v45 = vpop.eup %2060  ;;  %2072 = vrsqrt.f32 %v413_v36  ;;  %v771_v61 = vadd.f32 1.0, %v2059_v21  ;;  %v434_v0 = vsub.f32 %v53_v48, %v428_v57  ;;  %v476_v1 = vmul.f32 %v455_v3, %v2263_v13  ;;  %v54_v13 = vld [vmem:[%s2885_s4 + $0x2] sm:$0x1] }
 0x11d   :  { %v1908_v38 = vmul.f32 -1.442695, %v748_v2  ;;  %v423_v40 = vmul.f32 %v2061_v45, %v50_v63 }
 0x11e   :  { %v497_v58 = vrot.slane %v434_v0, %v2319_v50 }
 0x11f   :  { %v2063_v56 = vpop.eup %2062  ;;  %2074 = vpow2.f32 %v1908_v38  ;;  %v429_v8 = vmul.f32 %v423_v40, %v2313_v46  ;;  %v66_v46 = vld [vmem:[%s2880_s8 + $0x10] sm:$0xff]  ;;  %v459_v35 = vrot.slane %v423_v40, %v2319_v50 }
 0x120   :  { %v770_v34 = vadd.f32 1.0, %v2063_v56  ;;  %2076 = vrcp.f32 %v771_v61  ;;  %v2065_v53 = vpop.eup %2064  ;;  %v518_v27 = vadd.f32 %v497_v58, %v476_v1 }
 0x121   :  { %v2500_v30 = vmul.f32 %v2065_v53, %v517_v49  ;;  %v435_v59 = vsub.f32 %v53_v48, %v429_v8  ;;  %v477_v43 = vmul.f32 %v2259_v12, %v459_v35 }
 0x122   :  { %2078 = vrcp.f32 %v770_v34 }
 0x123   :  { %v501_v16 = vrot.slane %v435_v59, %v2319_v50 }
 0x124   :  { %v2067_v60 = vpop.eup %2066 }
 0x125   :  { %v2498_v14 = vmul.f32 %v2067_v60, %v516_v28  ;;  %v2069_v23 = vpop.eup %2068 }
 0x126   :  { %v424_v22 = vmul.f32 %v2069_v23, %v51_v54 }
 0x127   :  { %1996 = vmatprep.mubr.msk.f32.mxu0 %vm85_vm0, %v2498_v14  ;;  %2001 = vmatprep.mubr.msk.f32.mxu1 %vm85_vm0, %v2498_v14 }
 0x128   :  { %v2071_v39 = vpop.eup %2070  ;;  %1997 = vmatmul.mubr.msk.f32.vlgmr.msra.gmra.mxu0 %vm85_vm0, %v2500_v30  ;;  %2002 = vmatmul.mubr.msk.f32.vlgmr.msra.gmra.mxu1 %vm85_vm0, %v2500_v30  ;;  %v430_v5 = vmul.f32 %v424_v22, %v2452_v41 }
 0x129   :  { %v2073_v9 = vpop.eup %2072  ;;  %2010 = vmatpush3.msra.mxu1 %v2252_v10  ;;  %2005 = vmatpush3.msra.mxu0 %v2257_v11  ;;  %v773_v18 = vadd.f32 1.0, %v2071_v39  ;;  %v519_v11 = vadd.f32 %v501_v16, %v477_v43 }
 0x12a   :  { %2019 = vmatprep.subr.mxu1 %v66_v46  ;;  %2014 = vmatprep.subr.mxu0 %v63_v26  ;;  %v425_v19 = vmul.f32 %v2073_v9, %v51_v54  ;;  %v436_v12 = vsub.f32 %v54_v13, %v430_v5 }
 0x12b   :  { %2080 = vrcp.f32 %v773_v18 }
 0x12c   :  { %v2075_v24 = vpop.eup %2074  ;;  %v431_v36 = vmul.f32 %v425_v19, %v2454_v62  ;;  %v463_v62 = vrot.slane %v424_v22, %v2319_v50  ;;  %v467_v4 = vrot.slane %v425_v19, %v2319_v50  ;;  %v505_v55 = vrot.slane %v436_v12, %v2319_v50 }
 0x12d   :  { %v772_v7 = vadd.f32 1.0, %v2075_v24  ;;  %v2077_v29 = vpop.eup %2076 }
 0x12e   :  { %v2534_v37 = vmul.f32 %v2077_v29, %v519_v11  ;;  %v437_v41 = vsub.f32 %v54_v13, %v431_v36  ;;  %v478_v21 = vmul.f32 %v463_v62, %v2277_v20  ;;  %v479_v44 = vmul.f32 %v2267_v15, %v467_v4 }
 0x12f   :  { %v2079_v10 = vpop.eup %2078  ;;  %2082 = vrcp.f32 %v772_v7 }
 0x130   :  { %v2529_v6 = vmul.f32 %v2079_v10, %v518_v27  ;;  %v509_v33 = vrot.slane %v437_v41, %v2319_v50  ;;  %v520_v45 = vadd.f32 %v505_v55, %v478_v21 }
 0x132   :  { %2006 = vmatprep.mubr.msk.f32.mxu0 %vm85_vm0, %v2529_v6  ;;  %2011 = vmatprep.mubr.msk.f32.mxu1 %vm85_vm0, %v2529_v6  ;;  %v521_v42 = vadd.f32 %v509_v33, %v479_v44 }
 0x133   :  { %2007 = vmatmul.mubr.msk.f32.vlgmr.msra.gmra.mxu0 %vm85_vm0, %v2534_v37  ;;  %2012 = vmatmul.mubr.msk.f32.vlgmr.msra.gmra.mxu1 %vm85_vm0, %v2534_v37 }
 0x134   :  { %2020 = vmatpush3.msra.mxu1 %v66_v46  ;;  %2015 = vmatpush3.msra.mxu0 %v63_v26 }
 0x138   :  { %v2081_v2 = vpop.eup %2080 }
 0x139   :  { %v2552_v31 = vmul.f32 %v2081_v2, %v521_v42 }
 0x13c   :  { %v2083_v47 = vpop.eup %2082 }
 0x13d   :  { %v2550_v63 = vmul.f32 %v2083_v47, %v520_v45 }
 0x13f   :  { %2016 = vmatprep.mubr.msk.f32.mxu0 %vm85_vm0, %v2550_v63  ;;  %2021 = vmatprep.mubr.msk.f32.mxu1 %vm85_vm0, %v2550_v63 }
 0x140   :  { %2017 = vmatmul.mubr.msk.f32.vlgmr.msra.gmra.mxu0 %vm85_vm0, %v2552_v31  ;;  %2022 = vmatmul.mubr.msk.f32.vlgmr.msra.gmra.mxu1 %vm85_vm0, %v2552_v31 }
 0x1e8   :  { %v2562_v15 = vpop.f32.mrf.mxu0  ;;  %v2564_v20 = vpop.f32.mrf.mxu1 }
 0x1e9   :  { %v1031_v61 = vsel %vm85_vm0, %v2564_v20, 0.0  ;;  %v1041_v38 = vmul.f32 %v2564_v20, %v2564_v20 }
 0x1ea   :  { %v2570_v25 = vpop.f32.mrf.mxu1  ;;  %v2572_v56 = vpop.f32.mrf.mxu0  ;;  %v1032_v40 = vrot.slane %v1031_v61, 4 }
 0x1eb   :  { %v1049_v17 = vsel %vm85_vm0, %v1041_v38, 0.0  ;;  %v1024_v32 = vsel %vm85_vm0, %v2570_v25, 0.0  ;;  %v1040_v51 = vmul.f32 %v2570_v25, %v2570_v25  ;;  %v948_v34 = vsel %vm85_vm0, %v2572_v56, 0.0 }
 0x1ec   :  { %v964_v52 = vmul.f32 %v2572_v56, %v2572_v56  ;;  %v1025_v57 = vrot.slane %v1024_v32, 4  ;;  %v1033_v8 = vadd.f32 %v1032_v40, %v1031_v61  ;;  %v1050_v28 = vrot.slane %v1049_v17, 4 }
 0x1ed   :  { %v1042_v53 = vsel %vm85_vm0, %v1040_v51, 0.0  ;;  %v949_v60 = vrot.slane %v948_v34, 4 }
 0x1ee   :  { %v1026_v49 = vadd.f32 %v1025_v57, %v1024_v32  ;;  %v1043_v48 = vrot.slane %v1042_v53, 4  ;;  %v966_v0 = vsel %vm85_vm0, %v964_v52, 0.0  ;;  %v1034_v46 = vrot.slane %v1033_v8, 2 }
 0x1ef   :  { %v1051_v26 = vadd.f32 %v1050_v28, %v1049_v17  ;;  %v950_v39 = vadd.f32 %v949_v60, %v948_v34  ;;  %v967_v3 = vrot.slane %v966_v0, 4  ;;  %v965_v17 = vmul.f32 %v2562_v15, %v2562_v15 }
 0x1f0   :  { %v1027_v23 = vrot.slane %v1026_v49, 2  ;;  %v1044_v59 = vadd.f32 %v1043_v48, %v1042_v53  ;;  %v1035_v18 = vadd.f32 %v1034_v46, %v1033_v8  ;;  %v955_v48 = vsel %vm85_vm0, %v2562_v15, 0.0  ;;  %v1776_v46 = vld [vmem:[%s2886_s13] sm:$0xff] }
 0x1f1   :  { %v1052_v16 = vrot.slane %v1051_v26, 2  ;;  %v951_v22 = vrot.slane %v950_v39, 2  ;;  %v968_v24 = vadd.f32 %v967_v3, %v966_v0  ;;  %2028 = vmatprep.mubr.msk.f32.mxu0 %vm85_vm0, %v1776_v46 }
 0x1f2   :  { %v1028_v9 = vadd.f32 %v1027_v23, %v1026_v49  ;;  %v1045_v35 = vrot.slane %v1044_v59, 2  ;;  %v1036_v27 = vrot.slane %v1035_v18, 1 }
 0x1f3   :  { %v2587_v29 = vpop.f32.mrf.mxu1  ;;  %v1053_v10 = vadd.f32 %v1052_v16, %v1051_v26  ;;  %v952_v11 = vadd.f32 %v951_v22, %v950_v39  ;;  %v969_v5 = vrot.slane %v968_v24, 2  ;;  %v973_v26 = vsel %vm85_vm0, %v965_v17, 0.0 }
 0x1f4   :  { %v1029_v54 = vrot.slane %v1028_v9, 1  ;;  %v1046_v58 = vadd.f32 %v1045_v35, %v1044_v59  ;;  %v1359_v12 = vsel %vm85_vm0, %v2587_v29, 0.0  ;;  %v1369_v41 = vmul.f32 %v2587_v29, %v2587_v29  ;;  %v2615_v35 = vpop.f32.mrf.mxu0 }
 0x1f5   :  { %v1037_v4 = vadd.f32 %v1036_v27, %v1035_v18  ;;  %v1054_v55 = vrot.slane %v1053_v10, 1  ;;  %v1360_v33 = vrot.slane %v1359_v12, 4  ;;  %v2596_v44 = vpop.f32.mrf.mxu1  ;;  %v953_v2 = vrot.slane %v952_v11, 1 }
 0x1f6   :  { %v1030_v1 = vadd.f32 %v1029_v54, %v1028_v9  ;;  %v1047_v19 = vrot.slane %v1046_v58, 1  ;;  %v1377_v21 = vsel %vm85_vm0, %v1369_v41, 0.0  ;;  %v970_v45 = vadd.f32 %v969_v5, %v968_v24 }
 0x1f7   :  { %v1378_v42 = vrot.slane %v1377_v21, 4  ;;  %v1361_v61 = vadd.f32 %v1360_v33, %v1359_v12  ;;  %v1352_v40 = vsel %vm85_vm0, %v2596_v44, 0.0  ;;  %v2602_v32 = vmul.f32 0.125, %v1037_v4 }
 0x1f8   :  { %v2585_v43 = vmul.f32 0.125, %v1030_v1  ;;  %v1048_v7 = vadd.f32 %v1047_v19, %v1046_v58  ;;  %v1055_v51 = vadd.f32 %v1054_v55, %v1053_v10  ;;  %v954_v52 = vadd.f32 %v953_v2, %v952_v11 }
 0x1f9   :  { %v1379_v38 = vadd.f32 %v1378_v42, %v1377_v21  ;;  %v1362_v34 = vrot.slane %v1361_v61, 2  ;;  %v971_v57 = vrot.slane %v970_v45, 1  ;;  %v1353_v8 = vrot.slane %v1352_v40, 4  ;;  %v2633_v21 = vld [vmem:[%s2887_s11] sm:$0x1] }
 0x1fa   :  { %v1056_v36 = vmul.f32 0.125, %v1048_v7  ;;  %v1058_v13 = vmul.f32 %v2585_v43, %v2585_v43  ;;  %v1057_v0 = vmul.f32 0.125, %v1055_v51  ;;  %v1059_v23 = vmul.f32 %v2602_v32, %v2602_v32 }
 0x1fb   :  { %v1380_v53 = vrot.slane %v1379_v38, 2  ;;  %v1363_v28 = vadd.f32 %v1362_v34, %v1361_v61  ;;  %v1354_v49 = vadd.f32 %v1353_v8, %v1352_v40  ;;  %v2612_v39 = vmul.f32 0.125, %v954_v52  ;;  %v2639_v52 = vpop.f32.mrf.mxu0 }
 0x1fc   :  { %v1060_v62 = vsub.f32 %v1056_v36, %v1058_v13  ;;  %v972_v3 = vadd.f32 %v971_v57, %v970_v45  ;;  %v1368_v16 = vmul.f32 %v2596_v44, %v2596_v44  ;;  %v956_v22 = vrot.slane %v955_v48, 4 }
 0x1fd   :  { %v1381_v60 = vadd.f32 %v1380_v53, %v1379_v38  ;;  %v1364_v59 = vrot.slane %v1363_v28, 1  ;;  %v1355_v58 = vrot.slane %v1354_v49, 2  ;;  %v974_v24 = vrot.slane %v973_v26, 4  ;;  %v2644_v53 = vld [vmem:[%s2888_s12] sm:$0x1] }
 0x1fe   :  { %v1062_v47 = vadd.f32 1e-05, %v1060_v62  ;;  %v1061_v1 = vsub.f32 %v1057_v0, %v1059_v23  ;;  %v980_v7 = vmul.f32 0.125, %v972_v3  ;;  %v982_v27 = vmul.f32 %v2612_v39, %v2612_v39 }
 0x1ff   :  { %v1382_v9 = vrot.slane %v1381_v60, 1  ;;  %v1365_v54 = vadd.f32 %v1364_v59, %v1363_v28  ;;  %v1293_v10 = vmul.f32 %v2615_v35, %v2615_v35  ;;  %v1356_v36 = vadd.f32 %v1355_v58, %v1354_v49 }
 0x200   :  { %2084 = vrsqrt.f32 %v1062_v47  ;;  %v1370_v13 = vsel %vm85_vm0, %v1368_v16, 0.0  ;;  %v957_v41 = vadd.f32 %v956_v22, %v955_v48  ;;  %v1063_v62 = vadd.f32 1e-05, %v1061_v1  ;;  %v2647_v0 = vpop.f32.mrf.mxu1  ;;  %v2651_v3 = vpop.f32.mrf.mxu0 }
 0x201   :  { %v1383_v18 = vadd.f32 %v1382_v9, %v1381_v60  ;;  %v2619_v19 = vmul.f32 0.125, %v1365_v54  ;;  %v1283_v4 = vsel %vm85_vm0, %v2615_v35, 0.0  ;;  %v975_v33 = vadd.f32 %v974_v24, %v973_v26 }
 0x202   :  { %v984_v2 = vsub.f32 %v980_v7, %v982_v27  ;;  %v1301_v45 = vsel %vm85_vm0, %v1293_v10, 0.0  ;;  %v1357_v61 = vrot.slane %v1356_v36, 1  ;;  %v1371_v38 = vrot.slane %v1370_v13, 4 }
 0x203   :  { %v1385_v11 = vmul.f32 0.125, %v1383_v18  ;;  %v1387_v5 = vmul.f32 %v2619_v19, %v2619_v19  ;;  %v1284_v40 = vrot.slane %v1283_v4, 4  ;;  %v958_v17 = vrot.slane %v957_v41, 2 }
 0x204   :  { %2086 = vrsqrt.f32 %v1063_v62  ;;  %v976_v57 = vrot.slane %v975_v33, 2  ;;  %v1302_v8 = vrot.slane %v1301_v45, 4  ;;  %v986_v28 = vadd.f32 1e-05, %v984_v2 }
 0x205   :  { %v1389_v55 = vsub.f32 %v1385_v11, %v1387_v5  ;;  %v1358_v49 = vadd.f32 %v1357_v61, %v1356_v36  ;;  %v1372_v48 = vadd.f32 %v1371_v38, %v1370_v13  ;;  %v959_v23 = vadd.f32 %v958_v17, %v957_v41 }
 0x206   :  { %v977_v9 = vadd.f32 %v976_v57, %v975_v33  ;;  %v1303_v54 = vadd.f32 %v1302_v8, %v1301_v45  ;;  %v1687_v58 = vsel %vm85_vm0, %v2647_v0, 0.0  ;;  %v1611_v1 = vsel %vm85_vm0, %v2651_v3, 0.0 }
 0x207   :  { %v1391_v42 = vadd.f32 1e-05, %v1389_v55  ;;  %v1373_v26 = vrot.slane %v1372_v48, 2  ;;  %v2655_v16 = vmul.f32 0.125, %v1358_v49  ;;  %v1697_v7 = vmul.f32 %v2647_v0, %v2647_v0 }
 0x208   :  { %v960_v27 = vrot.slane %v959_v23, 1  ;;  %v1621_v5 = vmul.f32 %v2651_v3, %v2651_v3  ;;  %v978_v36 = vrot.slane %v977_v9, 1  ;;  %v1276_v13 = vsel %vm85_vm0, %v2639_v52, 0.0 }
 0x209   :  { %2088 = vrsqrt.f32 %v1391_v42  ;;  %v1374_v22 = vadd.f32 %v1373_v26, %v1372_v48  ;;  %v1705_v41 = vsel %vm85_vm0, %v1697_v7, 0.0  ;;  %v1612_v55 = vrot.slane %v1611_v1, 4 }
 0x20a   :  { %2090 = vrsqrt.f32 %v986_v28  ;;  %v1304_v2 = vrot.slane %v1303_v54, 2  ;;  %v1277_v42 = vrot.slane %v1276_v13, 4  ;;  %v1292_v61 = vmul.f32 %v2639_v52, %v2639_v52  ;;  %v2674_v28 = vld [vmem:[%s2887_s11 + $0x1] sm:$0x1] }
 0x20b   :  { %v1375_v11 = vrot.slane %v1374_v22, 1  ;;  %v961_v8 = vadd.f32 %v960_v27, %v959_v23  ;;  %v1613_v49 = vadd.f32 %v1612_v55, %v1611_v1  ;;  %v979_v48 = vadd.f32 %v978_v36, %v977_v9 }
 0x20d   :  { %v2085_v12 = vpop.eup %2084  ;;  %v1376_v62 = vadd.f32 %v1375_v11, %v1374_v22  ;;  %v1294_v22 = vsel %vm85_vm0, %v1292_v61, 0.0  ;;  %v2683_v9 = vmul.f32 0.125, %v961_v8  ;;  %v2687_v36 = vmul.f32 0.125, %v979_v48 }
 0x20e   :  { %v1066_v47 = vmul.f32 %v2085_v12, %v2633_v21 }
 0x20f   :  { %v1384_v38 = vmul.f32 0.125, %v1376_v62  ;;  %v2694_v62 = vld [vmem:[%s2889_s9] sm:$0x1] }
 0x210   :  { %v1068_v51 = vmul.f32 %v1066_v47, %v2585_v43  ;;  %v1077_v34 = vrot.slane %v1066_v47, %v2319_v50  ;;  %v1285_v43 = vadd.f32 %v1284_v40, %v1283_v4  ;;  %v1386_v4 = vmul.f32 %v2655_v16, %v2655_v16 }
 0x211   :  { %v1706_v47 = vrot.slane %v1705_v41, 4  ;;  %v1629_v40 = vsel %vm85_vm0, %v1621_v5, 0.0  ;;  %v2087_v17 = vpop.eup %2086 }
 0x212   :  { %v1070_v60 = vsub.f32 %v2644_v53, %v1068_v51  ;;  %v1084_v59 = vmul.f32 %v1077_v34, %v2570_v25  ;;  %v1286_v24 = vrot.slane %v1285_v43, 2  ;;  %v1688_v25 = vrot.slane %v1687_v58, 4 }
 0x213   :  { %v1707_v34 = vadd.f32 %v1706_v47, %v1705_v41  ;;  %v2689_v41 = vpop.f32.mrf.mxu1 }
 0x214   :  { %v1091_v46 = vrot.slane %v1070_v60, %v2319_v50  ;;  %v1689_v12 = vadd.f32 %v1688_v25, %v1687_v58  ;;  %v1287_v33 = vadd.f32 %v1286_v24, %v1285_v43  ;;  %v1388_v60 = vsub.f32 %v1384_v38, %v1386_v4 }
 0x215   :  { %v1630_v43 = vrot.slane %v1629_v40, 4  ;;  %v1305_v58 = vadd.f32 %v1304_v2, %v1303_v54  ;;  %v2678_v24 = vmul.f32 %v2087_v17, %v2633_v21  ;;  %v1295_v21 = vrot.slane %v1294_v22, 4 }
 0x216   :  { %v1098_v18 = vadd.f32 %v1091_v46, %v1084_v59  ;;  %v1690_v45 = vrot.slane %v1689_v12, 2  ;;  %v2089_v57 = vpop.eup %2088  ;;  %v1708_v46 = vrot.slane %v1707_v34, 2  ;;  %v1288_v26 = vrot.slane %v1287_v33, 1 }
 0x217   :  { %v2681_v23 = vmul.f32 %v2089_v57, %v2674_v28  ;;  %v1390_v27 = vadd.f32 1e-05, %v1388_v60  ;;  %v2091_v1 = vpop.eup %2090  ;;  %v1631_v11 = vadd.f32 %v1630_v43, %v1629_v40  ;;  %v1069_v4 = vmul.f32 %v2678_v24, %v2602_v32 }
 0x218   :  { %v1914_v10 = vmul.f32 -1.442695, %v1098_v18  ;;  %v1691_v51 = vadd.f32 %v1690_v45, %v1689_v12  ;;  %v1278_v18 = vadd.f32 %v1277_v42, %v1276_v13  ;;  %v1709_v7 = vadd.f32 %v1708_v46, %v1707_v34 }
 0x219   :  { %v1289_v13 = vadd.f32 %v1288_v26, %v1287_v33  ;;  %v1306_v12 = vrot.slane %v1305_v58, 1  ;;  %v1397_v55 = vmul.f32 %v2681_v23, %v2619_v19  ;;  %v2701_v47 = vmul.f32 %v2091_v1, %v2694_v62  ;;  %v2706_v33 = vld [vmem:[%s2888_s12 + $0x1] sm:$0x1] }
 0x21a   :  { %2092 = vpow2.f32 %v1914_v10  ;;  %v1692_v59 = vrot.slane %v1691_v51, 1  ;;  %v1614_v10 = vrot.slane %v1613_v49, 2  ;;  %v1710_v54 = vrot.slane %v1709_v7, 1 }
 0x21b   :  { %v1279_v2 = vrot.slane %v1278_v18, 2  ;;  %2094 = vrsqrt.f32 %v1390_v27  ;;  %v2712_v32 = vmul.f32 %v2683_v9, %v2683_v9  ;;  %v1632_v19 = vrot.slane %v1631_v11, 2 }
 0x21c   :  { %v1693_v25 = vadd.f32 %v1692_v59, %v1691_v51  ;;  %v1711_v45 = vadd.f32 %v1710_v54, %v1709_v7  ;;  %v1615_v42 = vadd.f32 %v1614_v10, %v1613_v49  ;;  %v1680_v17 = vsel %vm85_vm0, %v2689_v41, 0.0  ;;  %v2722_v59 = vpop.f32.mrf.mxu0 }
 0x21d   :  { %v2716_v34 = vmul.f32 0.125, %v1289_v13  ;;  %v1307_v57 = vadd.f32 %v1306_v12, %v1305_v58  ;;  %v1296_v8 = vadd.f32 %v1295_v21, %v1294_v22  ;;  %v1071_v60 = vsub.f32 %v2644_v53, %v1069_v4 }
 0x21e   :  { %v2685_v5 = vmul.f32 0.125, %v1693_v25  ;;  %v1713_v40 = vmul.f32 0.125, %v1711_v45  ;;  %v1399_v49 = vsub.f32 %v2706_v33, %v1397_v55  ;;  %v2720_v48 = vadd.f32 %v1279_v2, %v1278_v18 }
 0x21f   :  { %v992_v46 = vmul.f32 %v2701_v47, %v2612_v39  ;;  %v1616_v26 = vrot.slane %v1615_v42, 1  ;;  %v1681_v25 = vrot.slane %v1680_v17, 4  ;;  %v1409_v7 = vrot.slane %v2681_v23, %v2319_v50  ;;  %v2737_v39 = vld [vmem:[%s2890_s10] sm:$0x1] }
 0x220   :  { %v1715_v61 = vmul.f32 %v2685_v5, %v2685_v5  ;;  %v1633_v58 = vadd.f32 %v1632_v19, %v1631_v11  ;;  %v1696_v53 = vmul.f32 %v2689_v41, %v2689_v41  ;;  %v1081_v18 = vrot.slane %v2678_v24, %v2319_v50 }
 0x221   :  { %v1309_v27 = vmul.f32 0.125, %v1307_v57  ;;  %v1604_v10 = vsel %vm85_vm0, %v2722_v59, 0.0  ;;  %v1682_v1 = vadd.f32 %v1681_v25, %v1680_v17  ;;  %v1423_v23 = vrot.slane %v1399_v49, %v2319_v50 }
 0x222   :  { %v1717_v43 = vsub.f32 %v1713_v40, %v1715_v61  ;;  %v1620_v11 = vmul.f32 %v2722_v59, %v2722_v59  ;;  %v1698_v54 = vsel %vm85_vm0, %v1696_v53, 0.0  ;;  %v994_v24 = vsub.f32 %v2737_v39, %v992_v46 }
 0x223   :  { %v1311_v13 = vmul.f32 %v2716_v34, %v2716_v34  ;;  %v1683_v12 = vrot.slane %v1682_v1, 2  ;;  %v1699_v21 = vrot.slane %v1698_v54, 4  ;;  %v1095_v4 = vrot.slane %v1071_v60, %v2319_v50 }
 0x224   :  { %v1719_v22 = vadd.f32 1e-05, %v1717_v43  ;;  %v1413_v55 = vmul.f32 %v2587_v29, %v1409_v7  ;;  %v1617_v2 = vadd.f32 %v1616_v26, %v1615_v42  ;;  %v1634_v45 = vrot.slane %v1633_v58, 1 }
 0x225   :  { %v1001_v61 = vrot.slane %v2701_v47, %v2319_v50  ;;  %v1684_v19 = vadd.f32 %v1683_v12, %v1682_v1  ;;  %v1700_v40 = vadd.f32 %v1699_v21, %v1698_v54  ;;  %v1085_v17 = vmul.f32 %v2564_v20, %v1081_v18  ;;  %v2767_v21 = vld [vmem:[%s2887_s11 + $0x2] sm:$0x1] }
 0x226   :  { %v1297_v57 = vrot.slane %v1296_v8, 2  ;;  %v1622_v49 = vsel %vm85_vm0, %v1620_v11, 0.0  ;;  %v985_v43 = vsub.f32 %v2687_v36, %v2712_v32  ;;  %v1015_v60 = vrot.slane %v994_v24, %v2319_v50 }
 0x227   :  { %v2093_v38 = vpop.eup %2092  ;;  %v1313_v29 = vsub.f32 %v1309_v27, %v1311_v13  ;;  %v1685_v42 = vrot.slane %v1684_v19, 1  ;;  %v1099_v26 = vadd.f32 %v1095_v4, %v1085_v17  ;;  %v2755_v25 = vmul.f32 0.125, %v1617_v2 }
 0x228   :  { %v1106_v51 = vadd.f32 1.0, %v2093_v38  ;;  %v1605_v38 = vrot.slane %v1604_v10, 4  ;;  %v2095_v46 = vpop.eup %2094  ;;  %v1635_v47 = vadd.f32 %v1634_v45, %v1633_v58  ;;  %v1701_v7 = vrot.slane %v1700_v40, 2 }
 0x229   :  { %v1623_v53 = vrot.slane %v1622_v49, 4  ;;  %v1686_v18 = vadd.f32 %v1685_v42, %v1684_v19  ;;  %v1298_v11 = vadd.f32 %v1297_v57, %v1296_v8  ;;  %v1315_v54 = vadd.f32 1e-05, %v1313_v29  ;;  %v2779_v57 = vld [vmem:[%s2888_s12 + $0x2] sm:$0x1] }
 0x22a   :  { %2096 = vrcp.f32 %v1106_v51  ;;  %v1427_v51 = vadd.f32 %v1423_v23, %v1413_v55  ;;  %v1606_v20 = vadd.f32 %v1605_v38, %v1604_v10  ;;  %v1281_v23 = vrot.slane %v2720_v48, 1 }
 0x22b   :  { %2098 = vrsqrt.f32 %v1719_v22  ;;  %v1008_v22 = vmul.f32 %v1001_v61, %v2572_v56  ;;  %v1702_v36 = vadd.f32 %v1701_v7, %v1700_v40  ;;  %v1394_v27 = vmul.f32 %v2095_v46, %v2674_v28 }
 0x22c   :  { %v1921_v1 = vmul.f32 -1.442695, %v1427_v51  ;;  %v2760_v24 = vmul.f32 0.125, %v1686_v18  ;;  %v1915_v12 = vmul.f32 -1.442695, %v1099_v26  ;;  %v1637_v58 = vmul.f32 0.125, %v1635_v47 }
 0x22d   :  { %v1022_v32 = vadd.f32 %v1015_v60, %v1008_v22  ;;  %v1639_v56 = vmul.f32 %v2755_v25, %v2755_v25  ;;  %v1703_v10 = vrot.slane %v1702_v36, 1  ;;  %v1607_v8 = vrot.slane %v1606_v20, 2 }
 0x22e   :  { %v1624_v4 = vadd.f32 %v1623_v53, %v1622_v49  ;;  %v987_v2 = vadd.f32 1e-05, %v985_v43  ;;  %2100 = vpow2.f32 %v1921_v1  ;;  %v1282_v61 = vadd.f32 %v1281_v23, %v2720_v48 }
 0x22f   :  { %v1704_v28 = vadd.f32 %v1703_v10, %v1702_v36  ;;  %2102 = vrsqrt.f32 %v1315_v54  ;;  %v1396_v38 = vmul.f32 %v1394_v27, %v2655_v16  ;;  %v1714_v19 = vmul.f32 %v2760_v24, %v2760_v24  ;;  %v68_v10 = vld [vmem:[%s2889_s9 + $0x1] sm:$0x1] }
 0x230   :  { %2104 = vpow2.f32 %v1915_v12  ;;  %v1299_v40 = vrot.slane %v1298_v11, 1  ;;  %v1641_v17 = vsub.f32 %v1637_v58, %v1639_v56  ;;  %v1608_v49 = vadd.f32 %v1607_v8, %v1606_v20 }
 0x231   :  { %v1625_v43 = vrot.slane %v1624_v4, 2  ;;  %v1712_v60 = vmul.f32 0.125, %v1704_v28  ;;  %2106 = vrsqrt.f32 %v987_v2  ;;  %v1398_v29 = vsub.f32 %v2706_v33, %v1396_v38 }
 0x232   :  { %v2784_v46 = vmul.f32 0.125, %v1282_v61  ;;  %v1300_v26 = vadd.f32 %v1299_v40, %v1298_v11  ;;  %v1643_v47 = vadd.f32 1e-05, %v1641_v17  ;;  %v1405_v22 = vrot.slane %v1394_v27, %v2319_v50 }
 0x233   :  { %v1716_v42 = vsub.f32 %v1712_v60, %v1714_v19  ;;  %v1609_v53 = vrot.slane %v1608_v49, 1  ;;  %v1626_v20 = vadd.f32 %v1625_v43, %v1624_v4  ;;  %v1419_v23 = vrot.slane %v1398_v29, %v2319_v50 }
 0x234   :  { %v1310_v33 = vmul.f32 %v2784_v46, %v2784_v46  ;;  %v1308_v36 = vmul.f32 0.125, %v1300_v26 }
 0x235   :  { %v1718_v18 = vadd.f32 1e-05, %v1716_v42  ;;  %v1610_v54 = vadd.f32 %v1609_v53, %v1608_v49  ;;  %v1627_v27 = vrot.slane %v1626_v20, 1 }
 0x236   :  { %v1312_v8 = vsub.f32 %v1308_v36, %v1310_v33 }
 0x237   :  { %v2097_v13 = vpop.eup %2096  ;;  %2108 = vrsqrt.f32 %v1718_v18  ;;  %v2797_v4 = vmul.f32 0.125, %v1610_v54  ;;  %v1628_v2 = vadd.f32 %v1627_v27, %v1626_v20 }
 0x238   :  { %v2769_v55 = vmul.f32 %v2097_v13, %v1022_v32  ;;  %v2099_v45 = vpop.eup %2098  ;;  %2110 = vrsqrt.f32 %v1643_v47  ;;  %v1412_v32 = vmul.f32 %v1405_v22, %v2596_v44  ;;  %v1314_v19 = vadd.f32 1e-05, %v1312_v8 }
 0x239   :  { %v1723_v51 = vmul.f32 %v2099_v45, %v2767_v21  ;;  %v1636_v40 = vmul.f32 0.125, %v1628_v2  ;;  %v1638_v17 = vmul.f32 %v2797_v4, %v2797_v4 }
 0x23a   :  { %v1426_v58 = vadd.f32 %v1419_v23, %v1412_v32 }
 0x23b   :  { %v1725_v48 = vmul.f32 %v1723_v51, %v2685_v5  ;;  %v1737_v16 = vrot.slane %v1723_v51, %v2319_v50  ;;  %v2101_v12 = vpop.eup %2100  ;;  %v1640_v29 = vsub.f32 %v1636_v40, %v1638_v17 }
 0x23c   :  { %v2103_v56 = vpop.eup %2102  ;;  %v1435_v28 = vadd.f32 1.0, %v2101_v12  ;;  %v1920_v61 = vmul.f32 -1.442695, %v1426_v58 }
 0x23d   :  { %v1727_v7 = vsub.f32 %v2779_v57, %v1725_v48  ;;  %v1741_v1 = vmul.f32 %v2647_v0, %v1737_v16  ;;  %v2105_v0 = vpop.eup %2104  ;;  %v1319_v38 = vmul.f32 %v2103_v56, %v68_v10  ;;  %v2806_v48 = vld [vmem:[%s2890_s10 + $0x1] sm:$0x1]  ;;  %v69_v16 = vld [vmem:[%s2889_s9 + $0x2] sm:$0x1]  ;;  %v1642_v53 = vadd.f32 1e-05, %v1640_v29 }
 0x23e   :  { %v2107_v45 = vpop.eup %2106  ;;  %v1107_v44 = vadd.f32 1.0, %v2105_v0 }
 0x23f   :  { %v1751_v5 = vrot.slane %v1727_v7, %v2319_v50  ;;  %v991_v51 = vmul.f32 %v2107_v45, %v2694_v62  ;;  %v1321_v43 = vmul.f32 %v1319_v38, %v2716_v34 }
 0x241   :  { %v1755_v11 = vadd.f32 %v1751_v5, %v1741_v1  ;;  %v993_v42 = vmul.f32 %v991_v51, %v2683_v9  ;;  %v1323_v47 = vsub.f32 %v2806_v48, %v1321_v43  ;;  %v1333_v1 = vrot.slane %v1319_v38, %v2319_v50 }
 0x243   :  { %v1927_v13 = vmul.f32 -1.442695, %v1755_v11  ;;  %v995_v18 = vsub.f32 %v2737_v39, %v993_v42  ;;  %v1347_v23 = vrot.slane %v1323_v47, %v2319_v50  ;;  %v1337_v36 = vmul.f32 %v2615_v35, %v1333_v1 }
 0x244   :  { %v2109_v49 = vpop.eup %2108  ;;  %v1114_v1 = vadd.f32 %v2769_v55, %v2498_v14  ;;  %v1778_v14 = vld [vmem:[%s2886_s13 + $0x10] sm:$0xff] }
 0x245   :  { %2112 = vpow2.f32 %v1927_v13  ;;  %v2111_v60 = vpop.eup %2110  ;;  %v1722_v62 = vmul.f32 %v2109_v49, %v2767_v21  ;;  %v1019_v11 = vrot.slane %v995_v18, %v2319_v50  ;;  %v1351_v13 = vadd.f32 %v1347_v23, %v1337_v36 }
 0x246   :  { %2114 = vrcp.f32 %v1435_v28  ;;  %v1647_v7 = vmul.f32 %v2111_v60, %v69_v16 }
 0x247   :  { %2116 = vpow2.f32 %v1920_v61  ;;  %v1724_v26 = vmul.f32 %v1722_v62, %v2760_v24  ;;  %v1733_v34 = vrot.slane %v1722_v62, %v2319_v50  ;;  %v1005_v24 = vrot.slane %v991_v51, %v2319_v50 }
 0x248   :  { %2118 = vrcp.f32 %v1107_v44  ;;  %v1649_v33 = vmul.f32 %v1647_v7, %v2755_v25  ;;  %v1661_v0 = vrot.slane %v1647_v7, %v2319_v50 }
 0x249   :  { %2120 = vrsqrt.f32 %v1314_v19  ;;  %v1726_v20 = vsub.f32 %v2779_v57, %v1724_v26  ;;  %v1740_v21 = vmul.f32 %v1733_v34, %v2689_v41  ;;  %v72_v57 = vld [vmem:[%s2890_s10 + $0x2] sm:$0x1]  ;;  %v1009_v27 = vmul.f32 %v2562_v15, %v1005_v24 }
 0x24a   :  { %v1651_v12 = vsub.f32 %v72_v57, %v1649_v33  ;;  %v1665_v35 = vmul.f32 %v2651_v3, %v1661_v0 }
 0x24b   :  { %v1747_v9 = vrot.slane %v1726_v20, %v2319_v50  ;;  %v1023_v56 = vadd.f32 %v1019_v11, %v1009_v27 }
 0x24c   :  { %v1675_v28 = vrot.slane %v1651_v12, %v2319_v50 }
 0x24d   :  { %v1754_v39 = vadd.f32 %v1747_v9, %v1740_v21  ;;  %v1116_v9 = vmul.f32 0.70710677, %v1114_v1 }
 0x24e   :  { %v1679_v15 = vadd.f32 %v1675_v28, %v1665_v35 }
 0x24f   :  { %v1926_v32 = vmul.f32 -1.442695, %v1754_v39 }
 0x252   :  { %v2113_v22 = vpop.eup %2112 }
 0x253   :  { %v1763_v5 = vadd.f32 1.0, %v2113_v22  ;;  %v2115_v41 = vpop.eup %2114 }
 0x254   :  { %v2117_v54 = vpop.eup %2116  ;;  %v1441_v8 = vmul.f32 %v2115_v41, %v1351_v13 }
 0x255   :  { %2122 = vrcp.f32 %v1763_v5  ;;  %v2119_v58 = vpop.eup %2118  ;;  %v1434_v2 = vadd.f32 1.0, %v2117_v54 }
 0x256   :  { %2124 = vrsqrt.f32 %v1642_v53  ;;  %v2121_v25 = vpop.eup %2120  ;;  %v1113_v45 = vmul.f32 %v2119_v58, %v1023_v56  ;;  %v1443_v44 = vadd.f32 %v1441_v8, %v2534_v37 }
 0x257   :  { %2126 = vpow2.f32 %v1926_v32  ;;  %v1318_v61 = vmul.f32 %v2121_v25, %v68_v10 }
 0x258   :  { %2128 = vrcp.f32 %v1434_v2  ;;  %v1115_v38 = vadd.f32 %v1113_v45, %v2500_v30  ;;  %v1445_v51 = vmul.f32 0.70710677, %v1443_v44 }
 0x259   :  { %v1320_v40 = vmul.f32 %v1318_v61, %v2784_v46  ;;  %v1329_v37 = vrot.slane %v1318_v61, %v2319_v50 }
 0x25a   :  { %v1117_v43 = vmul.f32 0.70710677, %v1115_v38 }
 0x25b   :  { %v1322_v29 = vsub.f32 %v2806_v48, %v1320_v40  ;;  %v1336_v47 = vmul.f32 %v1329_v37, %v2639_v52 }
 0x25c   :  { %v1447_v3 = vadd.f32 %v1445_v51, %v1117_v43 }
 0x25d   :  { %v1343_v30 = vrot.slane %v1322_v29, %v2319_v50 }
 0x25f   :  { %v1350_v48 = vadd.f32 %v1343_v30, %v1336_v47 }
 0x262   :  { %v2123_v19 = vpop.eup %2122 }
 0x263   :  { %v2125_v17 = vpop.eup %2124  ;;  %v1769_v49 = vmul.f32 %v2123_v19, %v1679_v15 }
 0x264   :  { %v1646_v10 = vmul.f32 %v2125_v17, %v69_v16  ;;  %v2127_v62 = vpop.eup %2126 }
 0x265   :  { %v1771_v60 = vadd.f32 %v1769_v49, %v2552_v31  ;;  %v1762_v26 = vadd.f32 1.0, %v2127_v62  ;;  %v2129_v31 = vpop.eup %2128 }
 0x266   :  { %v1648_v46 = vmul.f32 %v1646_v10, %v2797_v4  ;;  %v1657_v7 = vrot.slane %v1646_v10, %v2319_v50  ;;  %v1440_v22 = vmul.f32 %v2129_v31, %v1350_v48 }
 0x267   :  { %v1773_v42 = vmul.f32 0.70710677, %v1771_v60  ;;  %2130 = vrcp.f32 %v1762_v26 }
 0x268   :  { %v1650_v16 = vsub.f32 %v72_v57, %v1648_v46  ;;  %v1664_v20 = vmul.f32 %v1657_v7, %v2722_v59  ;;  %v1442_v18 = vadd.f32 %v1440_v22, %v2529_v6  ;;  %v1779_v6 = vld [vmem:[%s2886_s13 + $0x18] sm:$0xff] }
 0x269   :  { %v1775_v34 = vadd.f32 %v1773_v42, %v1447_v3 }
 0x26a   :  { %v1671_v53 = vrot.slane %v1650_v16, %v2319_v50  ;;  %v1444_v52 = vmul.f32 0.70710677, %v1442_v18  ;;  %v1777_v50 = vld [vmem:[%s2886_s13 + $0x8] sm:$0xff] }
 0x26b   :  { %2024 = vmatprep.subr.msk.mxu0 %vm85_vm0, %v1775_v34 }
 0x26c   :  { %2025 = vmatpush3.xpose.msk.msra.mxu0 %vm85_vm0, %v1775_v34  ;;  %v1678_v4 = vadd.f32 %v1671_v53, %v1664_v20  ;;  %v1446_v23 = vadd.f32 %v1444_v52, %v1116_v9 }
 0x274   :  { %v2131_v5 = vpop.eup %2130 }
 0x275   :  { %v1768_v21 = vmul.f32 %v2131_v5, %v1678_v4 }
 0x277   :  { %v1770_v24 = vadd.f32 %v1768_v21, %v2550_v63 }
 0x279   :  { %v1772_v33 = vmul.f32 0.70710677, %v1770_v24 }
 0x27b   :  { %v1774_v57 = vadd.f32 %v1772_v33, %v1446_v23 }
 0x27d   :  { %2026 = vmatprep.subr.msk.mxu0 %vm85_vm0, %v1774_v57 }
 0x27e   :  { %2027 = vmatpush3.xpose.msk.msra.mxu0 %vm85_vm0, %v1774_v57 }
 0x281   :  { %2029 = vmatmul.mubr.msk.f32.vlgmr.msra.gmra.mxu0 %vm85_vm0, %v1777_v50 }
 0x282   :  { %2031 = vmatprep.mubr.msk.f32.mxu0 %vm85_vm0, %v1778_v14 }
 0x285   :  { %2032 = vmatmul.mubr.msk.f32.gmra.mxu0 %vm85_vm0, %v1779_v6 }
 0x341   :  { %v2030_v63 = vpop.f32.mrf.mxu0 }
 0x342   :  { %1885 = vst.msk [vmem:[%s2891_s14 + $0x8] sm:$0xff] %vm1883_vm1, %v2030_v63 }
 0x343   :  { %v1864_v59 = vpop.f32.mrf.mxu0 }
 0x344   :  { %1884 = vst.msk [vmem:[%s2891_s14] sm:$0xff] %vm1883_vm1, %v1864_v59 }
 0x345   :  { %v2033_v55 = vpop.f32.mrf.mxu0 }
 0x346   :  { %1887 = vst.msk [vmem:[%s2891_s14 + $0x18] sm:$0xff] %vm1883_vm1, %v2033_v55 }
 0x347   :  { %v1874_v39 = vpop.f32.mrf.mxu0 }
 0x348   :  { %1886 = vst.msk [vmem:[%s2891_s14 + $0x10] sm:$0xff] %vm1883_vm1, %v1874_v39 }

</bundles_post_ra>
